<compile_context>
chip_gen: v5e
topology: v5e:2x2
jax: 0.10.0
libtpu: 0.0.40
codegen_flags: <defaults>
</compile_context>

<pallas_src>
import functools

import numpy as np
import jax
import jax.numpy as jnp
from jax import lax
from jax.experimental import pallas as pl
from jax.experimental.pallas import tpu as pltpu


_SQRT_HALF = 0.7071067811865476


def _erf_approx(z):
    """Abramowitz & Stegun 7.1.26 erf approximation (max abs err ~1.5e-7).

    The 1/(1+p*|z|) term uses the EUP approximate reciprocal refined by one
    Newton step, pulling the divide off the (binding) VALU slot while keeping
    ~1e-7 relative accuracy.  All math stays in f32.
    """
    a1, a2, a3, a4, a5 = (0.254829592, -0.284496736, 1.421413741,
                          -1.453152027, 1.061405429)
    p = 0.3275911
    sign = jnp.where(z >= 0.0, 1.0, -1.0)
    az = jnp.abs(z)
    d = 1.0 + p * az
    t = pl.reciprocal(d, approx=True)
    t = t * (2.0 - d * t)                      # one Newton refinement
    poly = ((((a5 * t + a4) * t + a3) * t + a2) * t + a1) * t
    return sign * (1.0 - poly * jnp.exp(-az * az))


def _gelu_exact(x):
    # nn.GELU default is the exact (erf) form.
    return 0.5 * x * (1.0 + _erf_approx(x * _SQRT_HALF))


def _mlp_kernel(x_ref, w1_ref, b1_ref, dw_ref, bdw_ref, w2_ref, b2_ref,
                out_ref, *, H, W, h_tile):
    f32 = jnp.float32
    Ht = h_tile
    L = Ht * W                    # interior (output) lanes of this row tile
    Lext = (Ht + 2) * W           # interior + one halo row above / below
    hidden = w1_ref.shape[0]
    half = w2_ref.shape[1]

    t = pl.program_id(1)
    start = pl.multiple_of(t * L, 128)   # tile start within the row-padded image

    # ---- fc1: 1x1 conv == MXU matmul on the halo-extended window.
    x_ext = x_ref[0, :, pl.ds(start, Lext)]                       # (Cin, Lext) bf16
    h_ext = jnp.dot(w1_ref[...], x_ext,
                    preferred_element_type=f32) + b1_ref[...]     # (hidden, Lext) f32

    # The wrapper zero-pads one row above/below each image so the halo window
    # is always an in-bounds slice; those pad rows must be zero *after* the
    # fc1 bias (conv zero padding applies to the dwconv input).  One (1, Lext)
    # mask, broadcast along sublanes.
    glane = lax.broadcasted_iota(jnp.int32, (1, Lext), 1) + start
    in_image = jnp.logical_and(glane >= W, glane < (H + 1) * W)
    h_ext = jnp.where(in_image, h_ext, 0.0)

    # ---- DWConv: 3x3 depthwise, padding=1.
    # dy taps come from static row-shifted slices of the extended window (no
    # full-width rolls); dx taps are +-1 lane rolls over the 128-aligned
    # interior width.  Column masks are hoisted out of the 9-tap loop.
    # (Tap math kept in f32: safe on v5e's non-bf16 VPU and keeps the test
    #  tolerance margin; on v6e/v7x a bf16 tap path would halve VPU/XLU work.)
    lane = lax.broadcasted_iota(jnp.int32, (1, L), 1)
    col = (lane & (W - 1)) if (W & (W - 1)) == 0 else lax.rem(lane, W)
    ok_left = col >= 1            # valid positions for dx = -1 taps
    ok_right = col <= W - 2       # valid positions for dx = +1 taps

    dwv = dw_ref[...]                                             # (hidden, 9) f32
    y = jnp.zeros((hidden, L), f32)
    for dy in (-1, 0, 1):
        lo = (1 + dy) * W
        h_dy = h_ext[:, lo:lo + L]                                # (hidden, L)
        for dx in (-1, 0, 1):
            tap = (dy + 1) * 3 + (dx + 1)
            if dx == 0:
                shifted = h_dy
            else:
                shifted = pltpu.roll(h_dy, shift=(-dx) % L, axis=1)
                shifted = jnp.where(ok_left if dx < 0 else ok_right,
                                    shifted, 0.0)
            y = y + dwv[:, tap:tap + 1] * shifted
    y = y + bdw_ref[...]

    # ---- gated activation: chunk along channels, x1 * GELU(x2).
    x1 = y[:half]
    x2 = y[half:]
    g = x1 * _gelu_exact(x2)
    # (dropout p=0.0 is the identity)

    # ---- fc2: 1x1 conv == MXU matmul (Cout, half) @ (half, L), lane-dense out.
    out = jnp.dot(w2_ref[...], g.astype(jnp.bfloat16),
                  preferred_element_type=f32) + b2_ref[...]
    out_ref[0] = out.astype(out_ref.dtype)


def _vmem_config():
    """Per-generation (tile-sizing budget, compiler vmem limit) in bytes."""
    try:
        kind = jax.devices()[0].device_kind.lower()
    except Exception:
        kind = ""
    if "v7" in kind:                      # 64 MiB physical VMEM per core
        return 24 << 20, 48 << 20
    if "v6" in kind or "v5" in kind:      # 128 MiB physical VMEM
        return 48 << 20, 96 << 20
    return 24 << 20, None                 # unknown: conservative, default limit


def _pick_h_tile(H, W, C_in, hidden, C_out, budget):
    """Largest row tile (divisor of H, lane-dense: h_tile*W % 128 == 0 or full)
    whose per-step working set fits the VMEM budget."""
    cands = [d for d in range(1, H + 1)
             if H % d == 0 and ((d * W) % 128 == 0 or d == H)]

    def per_step_bytes(d):
        L, Lext = d * W, (d + 2) * W
        x_res = 2 * C_in * (H + 2) * W * 2             # resident bf16 input (x2 bufs)
        out_blk = 2 * C_out * L * 4                    # double-buffered f32 out tile
        inter = (hidden * Lext + 5 * hidden * L) * 4   # h_ext, h_dy/roll temps, y, g
        return x_res + out_blk + inter

    fits = [d for d in cands if per_step_bytes(d) <= budget]
    return max(fits) if fits else min(cands)


def mlp_forward(x, params, *, h_tile=None):
    B, C_in, H, W = x.shape
    P = H * W
    hidden = params['w1'].shape[0]
    assert hidden % 2 == 0
    half = hidden // 2
    C_out = params['w2'].shape[0]
    f32, bf16 = jnp.float32, jnp.bfloat16

    budget, vmem_limit = _vmem_config()
    if h_tile is None:
        h_tile = _pick_h_tile(H, W, C_in, hidden, C_out, budget)
    assert H % h_tile == 0 and ((h_tile * W) % 128 == 0 or h_tile == H)
    T = H // h_tile

    # Row-tiled, lane-dense layout.  One zero row above/below each image makes
    # every (h_tile + 2)-row halo window an in-bounds slice of the resident
    # input: no overlapping DMAs, no cross-tile carries.
    x_pad = jnp.pad(x, ((0, 0), (0, 0), (1, 1), (0, 0)))
    x_flat = x_pad.reshape(B, C_in, (H + 2) * W).astype(bf16)

    w1 = params['w1'].reshape(hidden, C_in).astype(bf16)
    b1 = params['b1'].reshape(hidden, 1).astype(f32)
    dw = params['dw'].reshape(hidden, 9).astype(f32)
    bdw = params['bdw'].reshape(hidden, 1).astype(f32)
    w2 = params['w2'].reshape(C_out, half).astype(bf16)
    b2 = params['b2'].reshape(C_out, 1).astype(f32)

    kernel = functools.partial(_mlp_kernel, H=H, W=W, h_tile=h_tile)
    Lp = (H + 2) * W
    L = h_tile * W

    out_flat = pl.pallas_call(
        kernel,
        out_shape=jax.ShapeDtypeStruct((B, C_out, P), f32),
        grid=(B, T),
        in_specs=[
            # Padded image: constant index over the (inner) tile axis -> stays
            # resident, fetched once per image.  Weights/biases likewise (no
            # re-DMA; pipeline_mode=pl.Buffered(1) could shave the second
            # buffer if VMEM ever gets tight).
            pl.BlockSpec((1, C_in, Lp), lambda b, t: (b, 0, 0)),
            pl.BlockSpec((hidden, C_in), lambda b, t: (0, 0)),
            pl.BlockSpec((hidden, 1), lambda b, t: (0, 0)),
            pl.BlockSpec((hidden, 9), lambda b, t: (0, 0)),
            pl.BlockSpec((hidden, 1), lambda b, t: (0, 0)),
            pl.BlockSpec((C_out, half), lambda b, t: (0, 0)),
            pl.BlockSpec((C_out, 1), lambda b, t: (0, 0)),
        ],
        # f32 output kept for exact-comparison headroom; a bf16 out_shape would
        # halve HBM writeback if the consumer tolerates it.
        out_specs=pl.BlockSpec((1, C_out, L), lambda b, t: (b, 0, t)),
        compiler_params=pltpu.CompilerParams(
            dimension_semantics=("parallel", "parallel"),
            vmem_limit_bytes=vmem_limit),
    )(x_flat, w1, b1, dw, bdw, w2, b2)
    return out_flat.reshape(B, C_out, H, W)


# ---------------------------------------------------------------------------
# Pure-JAX reference (XLA convs) for correctness checking.
# The 1x1 convs use the same bf16-rounded operands with f32 accumulation so
# the comparison isolates kernel errors from the quantization choice.
# ---------------------------------------------------------------------------
def mlp_reference(x, params):
    dn = ('NCHW', 'OIHW', 'NCHW')
    f32, bf16 = jnp.float32, jnp.bfloat16
    hidden = params['w1'].shape[0]

    def conv(z, w, b, padding, groups=1, **kw):
        y = lax.conv_general_dilated(z, w, (1, 1), padding,
                                     dimension_numbers=dn,
                                     feature_group_count=groups, **kw)
        return y + b[None, :, None, None]

    h = conv(x.astype(bf16), params['w1'].astype(bf16), params['b1'],
             ((0, 0), (0, 0)), preferred_element_type=f32)
    y = conv(h, params['dw'].astype(f32), params['bdw'], ((1, 1), (1, 1)),
             groups=hidden)
    x1, x2 = jnp.split(y, 2, axis=1)
    g = x1 * jax.nn.gelu(x2, approximate=False)
    out = conv(g.astype(bf16), params['w2'].astype(bf16), params['b2'],
               ((0, 0), (0, 0)), preferred_element_type=f32)
    return out


def init_params(key, in_features, hidden_features, out_features):
    ks = jax.random.split(key, 6)
    half = hidden_features // 2

    def rnd(k, shape, scale):
        return scale * jax.random.normal(k, shape, jnp.float32)

    return dict(
        w1=rnd(ks[0], (hidden_features, in_features, 1, 1), 0.3),
        b1=rnd(ks[1], (hidden_features,), 0.05),
        dw=rnd(ks[2], (hidden_features, 1, 3, 3), 0.2),
        bdw=rnd(ks[3], (hidden_features,), 0.05),
        w2=rnd(ks[4], (out_features, half, 1, 1), 0.2),
        b2=rnd(ks[5], (out_features,), 0.05),
    )


if __name__ == "__main__":
    B, C_in, H, W = 2, 4, 16, 16
    hidden = 32
    C_out = C_in

    key = jax.random.PRNGKey(0)
    kx, kp = jax.random.split(key)
    x = jax.random.normal(kx, (B, C_in, H, W), jnp.float32)
    params = init_params(kp, C_in, hidden, C_out)

    ref = jax.block_until_ready(mlp_reference(x, params))

    # Auto-sized tile (largest row tile that fits the per-generation budget).
    out = jax.block_until_ready(mlp_forward(x, params))
    np.testing.assert_allclose(np.asarray(out), np.asarray(ref),
                               rtol=2e-3, atol=3e-3)

    # Forced multi-tile run: exercises the row-tile grid + halo-window path.
    out_tiled = jax.block_until_ready(mlp_forward(x, params, h_tile=8))
    np.testing.assert_allclose(np.asarray(out_tiled), np.asarray(ref),
                               rtol=2e-3, atol=3e-3)

    print("KERNEL_OK")
</pallas_src>

<mosaic_0001>
module attributes {stable_mosaic.version = 11 : i64} {
  func.func @_mlp_kernel(%arg0: i32, %arg1: i32, %arg2: memref<1x4x288xbf16, #tpu.memory_space<vmem>>, %arg3: memref<32x4xbf16, #tpu.memory_space<vmem>>, %arg4: memref<32x1xf32, #tpu.memory_space<vmem>>, %arg5: memref<32x9xf32, #tpu.memory_space<vmem>>, %arg6: memref<32x1xf32, #tpu.memory_space<vmem>>, %arg7: memref<4x16xbf16, #tpu.memory_space<vmem>>, %arg8: memref<4x1xf32, #tpu.memory_space<vmem>>, %arg9: memref<1x4x256xf32, #tpu.memory_space<vmem>>) attributes {dimension_semantics = [#tpu.dimension_semantics<parallel>, #tpu.dimension_semantics<parallel>], iteration_bounds = array<i64: 2, 1>, scalar_prefetch = 0 : i64, scratch_operands = 0 : i64, tpu.core_type = #tpu.core_type<tc>, window_params = [{transform_indices = @transform_0, window_bounds = array<i64: 1, 4, 288>}, {pipeline_mode = #tpu.pipeline_mode<synchronous>, transform_indices = @transform_1, window_bounds = array<i64: 32, 4>}, {pipeline_mode = #tpu.pipeline_mode<synchronous>, transform_indices = @transform_2, window_bounds = array<i64: 32, 1>}, {pipeline_mode = #tpu.pipeline_mode<synchronous>, transform_indices = @transform_3, window_bounds = array<i64: 32, 9>}, {pipeline_mode = #tpu.pipeline_mode<synchronous>, transform_indices = @transform_4, window_bounds = array<i64: 32, 1>}, {pipeline_mode = #tpu.pipeline_mode<synchronous>, transform_indices = @transform_5, window_bounds = array<i64: 4, 16>}, {pipeline_mode = #tpu.pipeline_mode<synchronous>, transform_indices = @transform_6, window_bounds = array<i64: 4, 1>}, {transform_indices = @transform_7, window_bounds = array<i64: 1, 4, 256>}]} {
    %c256_i32 = arith.constant 256 : i32
    %0 = arith.muli %arg1, %c256_i32 : i32
    %1 = tpu.assume_multiple %0, 128 : i32
    %c0 = arith.constant 0 : index
    %c0_0 = arith.constant 0 : index
    %2 = arith.index_cast %1 : i32 to index
    %3 = vector.load %arg2[%c0, %c0_0, %2] : memref<1x4x288xbf16, #tpu.memory_space<vmem>>, vector<1x4x288xbf16>
    %4 = vector.shape_cast %3 : vector<1x4x288xbf16> to vector<4x288xbf16>
    %c0_1 = arith.constant 0 : index
    %c0_2 = arith.constant 0 : index
    %5 = vector.load %arg3[%c0_1, %c0_2] : memref<32x4xbf16, #tpu.memory_space<vmem>>, vector<32x4xbf16>
    %cst = arith.constant dense<0.000000e+00> : vector<32x288xf32>
    %6 = tpu.matmul %5, %4, %cst {dimension_numbers = #tpu.dot_dimension_numbers<[1], [0], [0], [1], [0, 0, 1, 1], [], []>} : vector<32x4xbf16>, vector<4x288xbf16>, vector<32x288xf32> -> vector<32x288xf32>
    %c0_3 = arith.constant 0 : index
    %c0_4 = arith.constant 0 : index
    %7 = vector.load %arg4[%c0_3, %c0_4] : memref<32x1xf32, #tpu.memory_space<vmem>>, vector<32x1xf32>
    %8 = vector.broadcast %7 : vector<32x1xf32> to vector<32x288xf32>
    %9 = arith.addf %6, %8 : vector<32x288xf32>
    %10 = tpu.iota {dimensions = array<i32: 1>} : vector<1x288xi32>
    %11 = vector.broadcast %1 : i32 to vector<1x288xi32>
    %12 = arith.addi %10, %11 : vector<1x288xi32>
    %c16_i32 = arith.constant 16 : i32
    %13 = vector.broadcast %c16_i32 : i32 to vector<1x288xi32>
    %14 = arith.cmpi sge, %12, %13 : vector<1x288xi32>
    %c272_i32 = arith.constant 272 : i32
    %15 = vector.broadcast %c272_i32 : i32 to vector<1x288xi32>
    %16 = arith.cmpi slt, %12, %15 : vector<1x288xi32>
    %17 = arith.andi %14, %16 : vector<1x288xi1>
    %cst_5 = arith.constant 0.000000e+00 : f32
    %18 = vector.shape_cast %17 : vector<1x288xi1> to vector<1x288xi1>
    %19 = vector.broadcast %18 : vector<1x288xi1> to vector<32x288xi1>
    %20 = vector.broadcast %cst_5 : f32 to vector<32x288xf32>
    %21 = arith.select %19, %9, %20 : vector<32x288xi1>, vector<32x288xf32>
    %22 = tpu.iota {dimensions = array<i32: 1>} : vector<1x256xi32>
    %c15_i32 = arith.constant 15 : i32
    %23 = vector.broadcast %c15_i32 : i32 to vector<1x256xi32>
    %24 = arith.andi %22, %23 : vector<1x256xi32>
    %c1_i32 = arith.constant 1 : i32
    %25 = vector.broadcast %c1_i32 : i32 to vector<1x256xi32>
    %26 = arith.cmpi sge, %24, %25 : vector<1x256xi32>
    %c14_i32 = arith.constant 14 : i32
    %27 = vector.broadcast %c14_i32 : i32 to vector<1x256xi32>
    %28 = arith.cmpi sle, %24, %27 : vector<1x256xi32>
    %c0_6 = arith.constant 0 : index
    %c0_7 = arith.constant 0 : index
    %29 = vector.load %arg5[%c0_6, %c0_7] : memref<32x9xf32, #tpu.memory_space<vmem>>, vector<32x9xf32>
    %cst_8 = arith.constant 0.000000e+00 : f32
    %30 = vector.broadcast %cst_8 : f32 to vector<32x256xf32>
    %31 = vector.extract_strided_slice %21 {offsets = [0, 0], sizes = [32, 256], strides = [1, 1]} : vector<32x288xf32> to vector<32x256xf32>
    %c1_i32_9 = arith.constant 1 : i32
    %32 = tpu.dynamic_rotate %31 by %c1_i32_9 dim 1 : vector<32x256xf32>, i32 -> vector<32x256xf32>
    %cst_10 = arith.constant 0.000000e+00 : f32
    %33 = vector.shape_cast %26 : vector<1x256xi1> to vector<1x256xi1>
    %34 = vector.broadcast %33 : vector<1x256xi1> to vector<32x256xi1>
    %35 = vector.broadcast %cst_10 : f32 to vector<32x256xf32>
    %36 = arith.select %34, %32, %35 : vector<32x256xi1>, vector<32x256xf32>
    %37 = vector.extract_strided_slice %29 {offsets = [0, 0], sizes = [32, 1], strides = [1, 1]} : vector<32x9xf32> to vector<32x1xf32>
    %38 = vector.broadcast %37 : vector<32x1xf32> to vector<32x256xf32>
    %39 = arith.mulf %38, %36 : vector<32x256xf32>
    %40 = arith.addf %30, %39 : vector<32x256xf32>
    %41 = vector.extract_strided_slice %29 {offsets = [0, 1], sizes = [32, 1], strides = [1, 1]} : vector<32x9xf32> to vector<32x1xf32>
    %42 = vector.broadcast %41 : vector<32x1xf32> to vector<32x256xf32>
    %43 = arith.mulf %42, %31 : vector<32x256xf32>
    %44 = arith.addf %40, %43 : vector<32x256xf32>
    %c255_i32 = arith.constant 255 : i32
    %45 = tpu.dynamic_rotate %31 by %c255_i32 dim 1 : vector<32x256xf32>, i32 -> vector<32x256xf32>
    %cst_11 = arith.constant 0.000000e+00 : f32
    %46 = vector.shape_cast %28 : vector<1x256xi1> to vector<1x256xi1>
    %47 = vector.broadcast %46 : vector<1x256xi1> to vector<32x256xi1>
    %48 = vector.broadcast %cst_11 : f32 to vector<32x256xf32>
    %49 = arith.select %47, %45, %48 : vector<32x256xi1>, vector<32x256xf32>
    %50 = vector.extract_strided_slice %29 {offsets = [0, 2], sizes = [32, 1], strides = [1, 1]} : vector<32x9xf32> to vector<32x1xf32>
    %51 = vector.broadcast %50 : vector<32x1xf32> to vector<32x256xf32>
    %52 = arith.mulf %51, %49 : vector<32x256xf32>
    %53 = arith.addf %44, %52 : vector<32x256xf32>
    %54 = vector.extract_strided_slice %21 {offsets = [0, 16], sizes = [32, 256], strides = [1, 1]} : vector<32x288xf32> to vector<32x256xf32>
    %c1_i32_12 = arith.constant 1 : i32
    %55 = tpu.dynamic_rotate %54 by %c1_i32_12 dim 1 : vector<32x256xf32>, i32 -> vector<32x256xf32>
    %cst_13 = arith.constant 0.000000e+00 : f32
    %56 = vector.shape_cast %26 : vector<1x256xi1> to vector<1x256xi1>
    %57 = vector.broadcast %56 : vector<1x256xi1> to vector<32x256xi1>
    %58 = vector.broadcast %cst_13 : f32 to vector<32x256xf32>
    %59 = arith.select %57, %55, %58 : vector<32x256xi1>, vector<32x256xf32>
    %60 = vector.extract_strided_slice %29 {offsets = [0, 3], sizes = [32, 1], strides = [1, 1]} : vector<32x9xf32> to vector<32x1xf32>
    %61 = vector.broadcast %60 : vector<32x1xf32> to vector<32x256xf32>
    %62 = arith.mulf %61, %59 : vector<32x256xf32>
    %63 = arith.addf %53, %62 : vector<32x256xf32>
    %64 = vector.extract_strided_slice %29 {offsets = [0, 4], sizes = [32, 1], strides = [1, 1]} : vector<32x9xf32> to vector<32x1xf32>
    %65 = vector.broadcast %64 : vector<32x1xf32> to vector<32x256xf32>
    %66 = arith.mulf %65, %54 : vector<32x256xf32>
    %67 = arith.addf %63, %66 : vector<32x256xf32>
    %c255_i32_14 = arith.constant 255 : i32
    %68 = tpu.dynamic_rotate %54 by %c255_i32_14 dim 1 : vector<32x256xf32>, i32 -> vector<32x256xf32>
    %cst_15 = arith.constant 0.000000e+00 : f32
    %69 = vector.shape_cast %28 : vector<1x256xi1> to vector<1x256xi1>
    %70 = vector.broadcast %69 : vector<1x256xi1> to vector<32x256xi1>
    %71 = vector.broadcast %cst_15 : f32 to vector<32x256xf32>
    %72 = arith.select %70, %68, %71 : vector<32x256xi1>, vector<32x256xf32>
    %73 = vector.extract_strided_slice %29 {offsets = [0, 5], sizes = [32, 1], strides = [1, 1]} : vector<32x9xf32> to vector<32x1xf32>
    %74 = vector.broadcast %73 : vector<32x1xf32> to vector<32x256xf32>
    %75 = arith.mulf %74, %72 : vector<32x256xf32>
    %76 = arith.addf %67, %75 : vector<32x256xf32>
    %77 = vector.extract_strided_slice %21 {offsets = [0, 32], sizes = [32, 256], strides = [1, 1]} : vector<32x288xf32> to vector<32x256xf32>
    %c1_i32_16 = arith.constant 1 : i32
    %78 = tpu.dynamic_rotate %77 by %c1_i32_16 dim 1 : vector<32x256xf32>, i32 -> vector<32x256xf32>
    %cst_17 = arith.constant 0.000000e+00 : f32
    %79 = vector.shape_cast %26 : vector<1x256xi1> to vector<1x256xi1>
    %80 = vector.broadcast %79 : vector<1x256xi1> to vector<32x256xi1>
    %81 = vector.broadcast %cst_17 : f32 to vector<32x256xf32>
    %82 = arith.select %80, %78, %81 : vector<32x256xi1>, vector<32x256xf32>
    %83 = vector.extract_strided_slice %29 {offsets = [0, 6], sizes = [32, 1], strides = [1, 1]} : vector<32x9xf32> to vector<32x1xf32>
    %84 = vector.broadcast %83 : vector<32x1xf32> to vector<32x256xf32>
    %85 = arith.mulf %84, %82 : vector<32x256xf32>
    %86 = arith.addf %76, %85 : vector<32x256xf32>
    %87 = vector.extract_strided_slice %29 {offsets = [0, 7], sizes = [32, 1], strides = [1, 1]} : vector<32x9xf32> to vector<32x1xf32>
    %88 = vector.broadcast %87 : vector<32x1xf32> to vector<32x256xf32>
    %89 = arith.mulf %88, %77 : vector<32x256xf32>
    %90 = arith.addf %86, %89 : vector<32x256xf32>
    %c255_i32_18 = arith.constant 255 : i32
    %91 = tpu.dynamic_rotate %77 by %c255_i32_18 dim 1 : vector<32x256xf32>, i32 -> vector<32x256xf32>
    %cst_19 = arith.constant 0.000000e+00 : f32
    %92 = vector.shape_cast %28 : vector<1x256xi1> to vector<1x256xi1>
    %93 = vector.broadcast %92 : vector<1x256xi1> to vector<32x256xi1>
    %94 = vector.broadcast %cst_19 : f32 to vector<32x256xf32>
    %95 = arith.select %93, %91, %94 : vector<32x256xi1>, vector<32x256xf32>
    %96 = vector.extract_strided_slice %29 {offsets = [0, 8], sizes = [32, 1], strides = [1, 1]} : vector<32x9xf32> to vector<32x1xf32>
    %97 = vector.broadcast %96 : vector<32x1xf32> to vector<32x256xf32>
    %98 = arith.mulf %97, %95 : vector<32x256xf32>
    %99 = arith.addf %90, %98 : vector<32x256xf32>
    %c0_20 = arith.constant 0 : index
    %c0_21 = arith.constant 0 : index
    %100 = vector.load %arg6[%c0_20, %c0_21] : memref<32x1xf32, #tpu.memory_space<vmem>>, vector<32x1xf32>
    %101 = vector.broadcast %100 : vector<32x1xf32> to vector<32x256xf32>
    %102 = arith.addf %99, %101 : vector<32x256xf32>
    %103 = vector.extract_strided_slice %102 {offsets = [0, 0], sizes = [16, 256], strides = [1, 1]} : vector<32x256xf32> to vector<16x256xf32>
    %104 = vector.extract_strided_slice %102 {offsets = [16, 0], sizes = [16, 256], strides = [1, 1]} : vector<32x256xf32> to vector<16x256xf32>
    %cst_22 = arith.constant 5.000000e-01 : f32
    %105 = vector.broadcast %cst_22 : f32 to vector<16x256xf32>
    %106 = arith.mulf %105, %104 : vector<16x256xf32>
    %cst_23 = arith.constant 0.707106769 : f32
    %107 = vector.broadcast %cst_23 : f32 to vector<16x256xf32>
    %108 = arith.mulf %104, %107 : vector<16x256xf32>
    %cst_24 = arith.constant 0.000000e+00 : f32
    %109 = vector.broadcast %cst_24 : f32 to vector<16x256xf32>
    %110 = arith.cmpf oge, %108, %109 : vector<16x256xf32>
    %cst_25 = arith.constant 1.000000e+00 : f32
    %cst_26 = arith.constant -1.000000e+00 : f32
    %111 = vector.broadcast %cst_25 : f32 to vector<16x256xf32>
    %112 = vector.broadcast %cst_26 : f32 to vector<16x256xf32>
    %113 = arith.select %110, %111, %112 : vector<16x256xi1>, vector<16x256xf32>
    %114 = math.absf %108 : vector<16x256xf32>
    %cst_27 = arith.constant 0.327591091 : f32
    %115 = vector.broadcast %cst_27 : f32 to vector<16x256xf32>
    %116 = arith.mulf %115, %114 : vector<16x256xf32>
    %cst_28 = arith.constant 1.000000e+00 : f32
    %117 = vector.broadcast %cst_28 : f32 to vector<16x256xf32>
    %118 = arith.addf %117, %116 : vector<16x256xf32>
    %119 = tpu.reciprocal %118 {approx = true} : vector<16x256xf32> -> vector<16x256xf32>
    %120 = arith.mulf %118, %119 : vector<16x256xf32>
    %cst_29 = arith.constant 2.000000e+00 : f32
    %121 = vector.broadcast %cst_29 : f32 to vector<16x256xf32>
    %122 = arith.subf %121, %120 : vector<16x256xf32>
    %123 = arith.mulf %119, %122 : vector<16x256xf32>
    %cst_30 = arith.constant 1.06140542 : f32
    %124 = vector.broadcast %cst_30 : f32 to vector<16x256xf32>
    %125 = arith.mulf %124, %123 : vector<16x256xf32>
    %cst_31 = arith.constant -1.45315206 : f32
    %126 = vector.broadcast %cst_31 : f32 to vector<16x256xf32>
    %127 = arith.addf %125, %126 : vector<16x256xf32>
    %128 = arith.mulf %127, %123 : vector<16x256xf32>
    %cst_32 = arith.constant 1.42141378 : f32
    %129 = vector.broadcast %cst_32 : f32 to vector<16x256xf32>
    %130 = arith.addf %128, %129 : vector<16x256xf32>
    %131 = arith.mulf %130, %123 : vector<16x256xf32>
    %cst_33 = arith.constant -0.284496725 : f32
    %132 = vector.broadcast %cst_33 : f32 to vector<16x256xf32>
    %133 = arith.addf %131, %132 : vector<16x256xf32>
    %134 = arith.mulf %133, %123 : vector<16x256xf32>
    %cst_34 = arith.constant 0.254829586 : f32
    %135 = vector.broadcast %cst_34 : f32 to vector<16x256xf32>
    %136 = arith.addf %134, %135 : vector<16x256xf32>
    %137 = arith.mulf %136, %123 : vector<16x256xf32>
    %cst_35 = arith.constant 0.000000e+00 : f32
    %138 = vector.broadcast %cst_35 : f32 to vector<16x256xf32>
    %139 = arith.subf %138, %114 : vector<16x256xf32>
    %140 = arith.mulf %139, %114 : vector<16x256xf32>
    %141 = math.exp %140 : vector<16x256xf32>
    %142 = arith.mulf %137, %141 : vector<16x256xf32>
    %cst_36 = arith.constant 1.000000e+00 : f32
    %143 = vector.broadcast %cst_36 : f32 to vector<16x256xf32>
    %144 = arith.subf %143, %142 : vector<16x256xf32>
    %145 = arith.mulf %113, %144 : vector<16x256xf32>
    %cst_37 = arith.constant 1.000000e+00 : f32
    %146 = vector.broadcast %cst_37 : f32 to vector<16x256xf32>
    %147 = arith.addf %146, %145 : vector<16x256xf32>
    %148 = arith.mulf %106, %147 : vector<16x256xf32>
    %149 = arith.mulf %103, %148 : vector<16x256xf32>
    %c0_38 = arith.constant 0 : index
    %c0_39 = arith.constant 0 : index
    %150 = vector.load %arg7[%c0_38, %c0_39] : memref<4x16xbf16, #tpu.memory_space<vmem>>, vector<4x16xbf16>
    %151 = arith.truncf %149 : vector<16x256xf32> to vector<16x256xbf16>
    %cst_40 = arith.constant dense<0.000000e+00> : vector<4x256xf32>
    %152 = tpu.matmul %150, %151, %cst_40 {dimension_numbers = #tpu.dot_dimension_numbers<[1], [0], [0], [1], [0, 0, 1, 1], [], []>} : vector<4x16xbf16>, vector<16x256xbf16>, vector<4x256xf32> -> vector<4x256xf32>
    %c0_41 = arith.constant 0 : index
    %c0_42 = arith.constant 0 : index
    %153 = vector.load %arg8[%c0_41, %c0_42] : memref<4x1xf32, #tpu.memory_space<vmem>>, vector<4x1xf32>
    %154 = vector.broadcast %153 : vector<4x1xf32> to vector<4x256xf32>
    %155 = arith.addf %152, %154 : vector<4x256xf32>
    %c0_43 = arith.constant 0 : index
    %c0_44 = arith.constant 0 : index
    %c0_45 = arith.constant 0 : index
    %156 = vector.load %arg9[%c0_43, %c0_44, %c0_45] : memref<1x4x256xf32, #tpu.memory_space<vmem>>, vector<1x4x256xf32>
    %157 = vector.shape_cast %156 : vector<1x4x256xf32> to vector<4x256xf32>
    %158 = vector.shape_cast %155 : vector<4x256xf32> to vector<1x4x256xf32>
    tpu.vector_store %arg9[%c0_43, %c0_44, %c0_45], %158 {strides = array<i32>} : memref<1x4x256xf32, #tpu.memory_space<vmem>>, vector<1x4x256xf32>,
    return
  }
  func.func @transform_0(%arg0: i32, %arg1: i32) -> (i32, i32, i32) {
    %c0_i32 = arith.constant 0 : i32
    %c0_i32_0 = arith.constant 0 : i32
    %c0_i32_1 = arith.constant 0 : i32
    return %arg0, %c0_i32, %c0_i32_0 : i32, i32, i32
  }
  func.func @transform_1(%arg0: i32, %arg1: i32) -> (i32, i32) {
    %c0_i32 = arith.constant 0 : i32
    %c0_i32_0 = arith.constant 0 : i32
    %c0_i32_1 = arith.constant 0 : i32
    return %c0_i32, %c0_i32_0 : i32, i32
  }
  func.func @transform_2(%arg0: i32, %arg1: i32) -> (i32, i32) {
    %c0_i32 = arith.constant 0 : i32
    %c0_i32_0 = arith.constant 0 : i32
    %c0_i32_1 = arith.constant 0 : i32
    return %c0_i32, %c0_i32_0 : i32, i32
  }
  func.func @transform_3(%arg0: i32, %arg1: i32) -> (i32, i32) {
    %c0_i32 = arith.constant 0 : i32
    %c0_i32_0 = arith.constant 0 : i32
    %c0_i32_1 = arith.constant 0 : i32
    return %c0_i32, %c0_i32_0 : i32, i32
  }
  func.func @transform_4(%arg0: i32, %arg1: i32) -> (i32, i32) {
    %c0_i32 = arith.constant 0 : i32
    %c0_i32_0 = arith.constant 0 : i32
    %c0_i32_1 = arith.constant 0 : i32
    return %c0_i32, %c0_i32_0 : i32, i32
  }
  func.func @transform_5(%arg0: i32, %arg1: i32) -> (i32, i32) {
    %c0_i32 = arith.constant 0 : i32
    %c0_i32_0 = arith.constant 0 : i32
    %c0_i32_1 = arith.constant 0 : i32
    return %c0_i32, %c0_i32_0 : i32, i32
  }
  func.func @transform_6(%arg0: i32, %arg1: i32) -> (i32, i32) {
    %c0_i32 = arith.constant 0 : i32
    %c0_i32_0 = arith.constant 0 : i32
    %c0_i32_1 = arith.constant 0 : i32
    return %c0_i32, %c0_i32_0 : i32, i32
  }
  func.func @transform_7(%arg0: i32, %arg1: i32) -> (i32, i32, i32) {
    %c0_i32 = arith.constant 0 : i32
    %c0_i32_0 = arith.constant 0 : i32
    return %arg0, %c0_i32, %arg1 : i32, i32, i32
  }
}

</mosaic_0001>

<bundles_post_ra>
// kernel: tpu_custom_call.1
= control target key start
LH: loop header
LB: loop body
LE: loop exit
PB: predicated region body
PF: predicated region fallthrough
CT: control target
= control target key end

     0   :  { %12 = vsyncpa [#allocation3], 0  ;;  %s2860_s0 = inlined_call_operand.vmem [shape: bf16[2,4,288], index: 0, kind: input, shape index: {}]   ;;  %s2861_s1 = inlined_call_operand.vmem [shape: bf16[32,4], index: 1, kind: input, shape index: {}]   ;;  %s2862_s2 = inlined_call_operand.vmem [shape: f32[32,1], index: 2, kind: input, shape index: {}]   ;;  %s2863_s3 = inlined_call_operand.vmem [shape: f32[32,9], index: 3, kind: input, shape index: {}]   ;;  %s2864_s4 = inlined_call_operand.vmem [shape: f32[32,1], index: 4, kind: input, shape index: {}]   ;;  %s2865_s5 = inlined_call_operand.vmem [shape: bf16[4,16], index: 5, kind: input, shape index: {}]   ;;  %s2866_s6 = inlined_call_operand.vmem [shape: f32[4,1], index: 6, kind: input, shape index: {}]   ;;  %s2867_s7 = inlined_call_operand.hbm [shape: f32[2,4,256], index: 7, kind: output, shape index: {}]  }
   0x1   :  { %14 = vsyncpa [#allocation3 + $0x1], 0  ;;  %s1733_s24 = smov 0   ;;  %s1735_s25 = smov 0  }
   0x2   :  { %s1737_s26 = smov 0   ;;  %s1739_s27 = smov 0  }
   0x3   :  { %s1741_s28 = smov 0   ;;  %s1743_s29 = smov 0  }
   0x4 LB: > { %s1447_s30 = sadd.s32 4294967295, %s1677_s29   ;;  %s1448_s8 = sadd.s32 4294967294, %s1677_s29   ;;  %s1677_s29 = sphi %s1743_s29, %s20_s29   ;;  %s1673_s28 = sphi %s1741_s28, %s2913_s28   ;;  %s1669_s27 = sphi %s1739_s27, %s2912_s27   ;;  %s1665_s26 = sphi %s1737_s26, %s2911_s26   ;;  %s1661_s25 = sphi %s1735_s25, %s2910_s25   ;;  %s1657_s24 = sphi %s1733_s24, %s2909_s24  }
   0x5   : > { %s32_s9 = sadd.s32 1, %s1673_s28  ;;  %s193_s10 = sadd.s32 1, %s1665_s26 }
   0x6   : > { %p34_p0 = scmp.ge.s32.totalorder %s32_s9, 2  ;;  %p203_p1 = scmp.ne.s32.totalorder %s1665_s26, %s1661_s25 }
   0x7   : > { %p204_p2 = scmp.eq.s32.totalorder %s1447_s30, 1  ;;  %p209_p3 = scmp.ne.s32.totalorder %s1661_s25, %s1657_s24 }
   0x8   : > { %s2915_s9 = smov (%p34_p0, %s32_s9), 0  ;;  %p210_p5 = scmp.eq.s32.totalorder %s1448_s8, 1 }
   0x9   : > { %p1773_p4 = por %p204_p2, %p203_p1  ;;  %s188_s12 = ssub.s32 %s1673_s28, %s2915_s9 }
   0xa   : > { %p1451_p6 = scmp.ge.s32.totalorder %s1677_s29, 1  ;;  %p191_p7 = scmp.eq.s32.totalorder %s188_s12, 0 }
   0xb   : > { %p1780_p8 = por %p210_p5, %p209_p3  ;;  %p254_p9 = scmp.lt.s32.totalorder %s1677_s29, 3 }
   0xc   : > { %s1786_s14 = scalar_select %p191_p7, %s1665_s26, %s193_s10  }
   0xd   : > { %p255_p10 = pnand %p1451_p6, %p254_p9 }
   0xf   : > { %258 = sbr.rel (%p255_p10) target bundleno = 894 (0x37e), region = 48 }
  0x14   : > { %v1791_v0 = vld [vmem:[%s2863_s3 + $0x10] sm:$0xff]  ;;  %p286_p11 = scmp.lt.s32.totalorder %s1669_s27, 1  ;;  %v1679_v1 = vmov 1   ;;  %v2875_v3 = vmov 0   ;;  %v1808_v5 = vld [vmem:[%s2863_s3 + $0x8] sm:$0xff]  ;;  %v306_v6 = vld [vmem:[%s2862_s2 + $0x18] sm:$0xff]  ;;  %v413_v31 = vlaneseq }
  0x15   : > { %1552 = vset.pattern.permute.xlu0 %v1679_v1  ;;  %v305_v2 = vld [vmem:[%s2862_s2 + $0x10] sm:$0xff]  ;;  %1548 = vset.pattern.permute.xlu1 %v2875_v3  ;;  %v1681_v7 = vmov 2   ;;  %vm349_vm0 = vcmask 1041408   ;;  %v1475_v13 = vld [vmem:[%s2861_s1] sm:$0xff]  ;;  %vm342_vm1 = vcmask 31744   ;;  %v1682_v16 = vmov 3  }
  0x16   : > { %540 = vperm.xlu0 %1552, %v1791_v0   ;;  %s287_s19 = scalar_select %p286_p11, %s1669_s27, 1  ;;  %319 = vperm.xlu1 %1548, %v305_v2   ;;  %v1821_v15 = vld [vmem:[%s2863_s3] sm:$0xff]  ;;  %v1683_v17 = vmov 4   ;;  %v1833_v18 = vld [vmem:[%s2863_s3 + $0x18] sm:$0xff]  ;;  %v1476_v19 = vld [vmem:[%s2861_s1 + $0x8] sm:$0xff]  ;;  %v2874_v20 = vmov 7  }
  0x17   : > { %1549 = vset.pattern.permute.xlu2 %v2875_v3  ;;  %v303_v21 = vld [vmem:[%s2862_s2] sm:$0xff]  ;;  %v304_v22 = vld [vmem:[%s2862_s2 + $0x8] sm:$0xff]  ;;  %v1878_v34 = vand.u32 127, %v413_v31  ;;  %s1685_s12 = smov 127   ;;  %s1686_s15 = smov 1   ;;  %vm668_vm10 = vcmask 916480  }
  0x18   : > { %s1478_s20 = smul.u32 6, %s287_s19  ;;  %507 = vperm.xlu2 %1549, %v1791_v0   ;;  %s1687_s16 = smov 112   ;;  %vm925_vm11 = vcmask 785408   ;;  %vm1319_vm15 = vcmask 130048  }
  0x19   : > { %v1883_v36 = vadd.s32 256, %v1878_v34  ;;  %vm421_vm3 = vcmp.ge.s32.totalorder %v1878_v34, 16  ;;  %s1688_s17 = smov 96   ;;  %vm474_vm4 = vcmp.lt.s32.totalorder %v1878_v34, 1  ;;  %vm579_vm7 = vcmp.lt.s32.totalorder %v1878_v34, 127  ;;  %s283_s19 = sand.u32 1, %s1661_s25  }
  0x1a   : > { %s290_s23 = scalar_lea.vmem %s2860_s0, %s1478_s20  ;;  %s1452_s20 = sshll.u32 %s283_s19, 3 }
  0x1b   : > { %v298_v4 = vld [vmem:[%s290_s23] sm:$0x3f]  ;;  %vm426_vm2 = vcmp.lt.s32.totalorder %v1883_v36, 272  ;;  %s1477_s21 = sshll.u32 %s1669_s27, 3  ;;  %s285_s8 = scalar_lea.vmem [#allocation2], %s1452_s20 }
  0x1c   : > { %338 = vst [vmem:[#allocation1] ss:$4 sm:$0xff] %v298_v4  ;;  %s1370_s30 = scalar_lea.hbm %s2867_s7, %s1477_s21  ;;  %s1372_s10 = sshll.u32 %s285_s8, 4  ;;  %s1373_s10 = int_to_ptr.vmem [resolvable:$true] %s1372_s10 }
  0x1d   : > { %s1619_s20 = scalar_lea.hbm %s2867_s7, 16 }
  0x1e   : > { %1554 = vset.pattern.permute.xlu0 %v1681_v7  ;;  %324 = vperm.xlu1 %1548, %v306_v6  }
  0x1f   : > { %605 = vperm.xlu0 %1554, %v1808_v5  }
  0x20   : > { %1551 = vset.pattern.permute.xlu2 %v1679_v1 }
  0x21   : > { %536 = vperm.xlu2 %1551, %v1808_v5  }
  0x23   : > { %v339_v8 = vld.sshfl [vmem:[#allocation1] sm:$0xff pattern:$0x73625140]  ;;  %v340_v9 = vld.sshfl [vmem:[#allocation1 + $0x8] sm:$0xff pattern:$0x73625140] }
  0x24   : > { %v350_v10 = vsel %vm349_vm0, %v339_v8, 0  ;;  %v352_v11 = vsel %vm349_vm0, %v340_v9, 0  ;;  %v341_v12 = vld.sshfl [vmem:[#allocation1 + $0x10] sm:$0xff pattern:$0x73625140] }
  0x25   : > { %363 = vmatpush.bf16.msra.mxu0 %v350_v10  ;;  %382 = vmatpush.bf16.msra.mxu1 %v352_v11  ;;  %v354_v14 = vsel %vm349_vm0, %v341_v12, 0 }
  0x26   : > { %401 = vmatpush.bf16.msra.mxu2 %v354_v14  ;;  %502 = vperm.xlu1 %1548, %v1808_v5  }
  0x27   : > { %1556 = vset.pattern.permute.xlu0 %v1682_v16 }
  0x28   : > { %718 = vperm.xlu0 %1556, %v1821_v15   ;;  %1462 = vmatmul.msk.bf16.vlgmr.msra.gmra.mxu0 %vm342_vm1, %v1475_v13 }
  0x29   : > { %1464 = vmatmul.msk.bf16.vlgmr.msra.gmra.mxu1 %vm342_vm1, %v1475_v13  ;;  %1466 = vmatmul.msk.bf16.vlgmr.msra.gmra.mxu2 %vm342_vm1, %v1475_v13 }
  0x2a   : > { %1553 = vset.pattern.permute.xlu2 %v1681_v7 }
  0x2b   : > { %601 = vperm.xlu2 %1553, %v1821_v15  }
  0x2e   : > { %1550 = vset.pattern.permute.xlu1 %v1679_v1 }
  0x2f   : > { %532 = vperm.xlu1 %1550, %v1821_v15  }
  0x30   : > { %1560 = vset.pattern.permute.xlu0 %v1683_v17 }
  0x31   : > { %754 = vperm.xlu0 %1560, %v1808_v5  }
  0x33   : > { %613 = vperm.xlu2 %1553, %v1833_v18  }
  0x37   : > { %544 = vperm.xlu1 %1550, %v1833_v18  }
  0x38   : > { %1463 = vmatmul.msk.bf16.gmra.mxu0 %vm342_vm1, %v1476_v19 }
  0x39   : > { %1465 = vmatmul.msk.bf16.gmra.mxu1 %vm342_vm1, %v1476_v19  ;;  %1467 = vmatmul.msk.bf16.gmra.mxu2 %vm342_vm1, %v1476_v19  ;;  %vm1352_vm1 = vcmask 1043456  }
  0x3a   : > { %1562 = vset.pattern.permute.xlu0 %v2874_v20 }
  0x3b   : > { %1015 = vperm.xlu0 %1562, %v1791_v0   ;;  %1558 = vset.pattern.permute.xlu2 %v1682_v16 }
  0x3c   : > { %726 = vperm.xlu2 %1558, %v1791_v0  }
  0x3f   : > { %1555 = vset.pattern.permute.xlu1 %v1681_v7 }
  0x40   : > { %609 = vperm.xlu1 %1555, %v1791_v0  }
  0x43   : > { %1563 = vset.pattern.permute.xlu0 %v2875_v3 }
  0x44   : > { %309 = vperm.xlu0 %1563, %v303_v21   ;;  %1559 = vset.pattern.permute.xlu2 %v1683_v17 }
  0x45   : > { %750 = vperm.xlu2 %1559, %v1821_v15  }
  0x48   : > { %1557 = vset.pattern.permute.xlu1 %v1682_v16 }
  0x49   : > { %722 = vperm.xlu1 %1557, %v1808_v5  }
  0x4c   : > { %314 = vperm.xlu0 %1563, %v304_v22  }
  0x4d   : > { %762 = vperm.xlu2 %1559, %v1833_v18  }
  0x51   : > { %730 = vperm.xlu1 %1557, %v1833_v18  }
  0x54   : > { %497 = vperm.xlu0 %1563, %v1821_v15  }
  0x59   : > { %1561 = vset.pattern.permute.xlu1 %v1683_v17 }
  0x5a   : > { %758 = vperm.xlu1 %1561, %v1791_v0  }
  0x62   : > { %1564 = vset.pattern.permute.xlu1 %v2874_v20 }
  0x72   : > { %v1866_v25 = vpop.permute.xlu2 %507 }
  0x7b   : > { %v1870_v27 = vpop.permute.xlu2 %536 }
  0x85   : > { %v1874_v29 = vpop.permute.xlu2 %601 }
  0x88   : > { %v1862_v23 = vpop.permute.xlu0 %540  ;;  %v320_v37 = vpop.permute.xlu1 %319 }
  0x8d   : > { %v1880_v35 = vpop.permute.xlu2 %613 }
  0x90   : > { %v325_v56 = vpop.permute.xlu1 %324 }
  0x91   : > { %v1864_v24 = vpop.permute.xlu0 %605 }
  0x96   : > { %v1898_v45 = vpop.permute.xlu2 %726 }
  0x98   : > { %v1940_v62 = vpop.permute.xlu1 %502 }
  0x9a   : > { %v1868_v26 = vpop.permute.xlu0 %718 }
  0x9f   : > { %v1923_v54 = vpop.permute.xlu2 %750 }
  0xa1   : > { %v1959_v6 = vpop.permute.xlu1 %532 }
  0xa3   : > { %v1872_v28 = vpop.permute.xlu0 %754 }
  0xa5   : > { %v365_v46 = vpop.f32.mrf.mxu0 }
  0xa6   : > { %v384_v30 = vpop.f32.mrf.mxu1 }
  0xa9   : > { %v1967_v9 = vpop.permute.xlu1 %544 }
  0xac   : > { %v403_v38 = vpop.f32.mrf.mxu2 }
  0xad   : > { %v1876_v32 = vpop.permute.xlu0 %1015  ;;  %v367_v58 = vpop.f32.mrf.mxu0 }
  0xae   : > { %v386_v33 = vpop.f32.mrf.mxu1 }
  0xb2   : > { %v1979_v13 = vpop.permute.xlu1 %609 }
  0xb4   : > { %v405_v53 = vpop.f32.mrf.mxu2 }
  0xb5   : > { %v370_v63 = vpop.f32.mrf.mxu0 }
  0xb6   : > { %v310_v39 = vpop.permute.xlu0 %309  ;;  %v389_v40 = vpop.f32.mrf.mxu1  ;;  %v371_v1 = vadd.f32 %v370_v63, %v320_v37 }
  0xb7   : > { %v1886_v41 = vadd.f32 %v384_v30, %v310_v39  ;;  %v404_v42 = vadd.f32 %v403_v38, %v310_v39  ;;  %v1888_v43 = vadd.f32 %v389_v40, %v320_v37  ;;  %v366_v49 = vadd.f32 %v365_v46, %v310_v39 }
  0xb8   : > { %v1952_v4 = vsel %vm421_vm3, %v371_v1, 0.0  ;;  %v2870_v38 = vmov 5  }
  0xb9   : > { %2886 = vst [vmem:[#allocation5_spill] sm:$0xff] %v1886_v41  ;;  %v1892_v44 = vsel %vm426_vm2, %v404_v42, 0.0  ;;  %571 = vrot.lane.b32.xlu1 %v1886_v41, %s1685_s12  ;;  %466 = vrot.lane.b32.xlu2 %v1886_v41, %s1686_s15  ;;  %v1904_v47 = vmul.f32 %v1876_v32, %v1888_v43  ;;  %v1908_v48 = vmul.f32 %v1862_v23, %v1888_v43  ;;  %v1915_v52 = vsel %vm421_vm3, %v366_v49, 0.0 }
  0xba   : > { %648 = vrot.lane.b32.xlu0 %v1892_v44, %s1687_s16  ;;  %v765_v57 = vmul.f32 %v1923_v54, %v1915_v52  ;;  %v766_v2 = vmul.f32 %v1923_v54, %v1886_v41  ;;  %1566 = vset.pattern.permute.xlu2 %v2870_v38  ;;  %v415_v42 = vadd.s32 128, %v1878_v34  ;;  %v448_v49 = vand.u32 15, %v1878_v34 }
  0xbb   : > { %v1993_v19 = vpop.permute.xlu1 %722 }
  0xbc   : > { %v408_v7 = vpop.f32.mrf.mxu2  ;;  %vm2047_vm5 = vcmp.ge.s32.totalorder %v448_v49, 1  ;;  %vm2075_vm8 = vcmp.le.s32.totalorder %v448_v49, 14 }
  0xbd   : > { %v409_v8 = vadd.f32 %v408_v7, %v320_v37  ;;  %v372_v11 = vpop.f32.mrf.mxu0  ;;  %v547_v7 = vmul.f32 %v1959_v6, %v1915_v52 }
  0xbe   : > { %v315_v50 = vpop.permute.xlu0 %314  ;;  %v373_v12 = vadd.f32 %v372_v11, %v325_v56  ;;  %v391_v16 = vpop.f32.mrf.mxu1 }
  0xbf   : > { %v1911_v51 = vadd.f32 %v386_v33, %v315_v50  ;;  %v406_v55 = vadd.f32 %v405_v53, %v315_v50  ;;  %v368_v60 = vadd.f32 %v367_v58, %v315_v50  ;;  %v1971_v10 = vsel %vm426_vm2, %v409_v8, 0.0  ;;  %v2018_v33 = vpop.permute.xlu2 %762 }
  0xc0   : > { %v1983_v14 = vsel %vm421_vm3, %v373_v12, 0.0  ;;  %v1991_v17 = vadd.f32 %v391_v16, %v325_v56  ;;  %v449_v50 = vand.u32 15, %v415_v42  ;;  %v767_v53 = vmul.f32 %v1923_v54, %v1892_v44 }
  0xc1   : > { %646 = vrot.lane.b32.xlu2 %v1886_v41, %s1687_s16  ;;  %644 = vrot.lane.b32.xlu1 %v1915_v52, %s1687_s16  ;;  %v1932_v59 = vsel %vm426_vm2, %v406_v55, 0.0  ;;  %v1938_v61 = vsel %vm421_vm3, %v368_v60, 0.0  ;;  %v548_v8 = vmul.f32 %v1959_v6, %v1886_v41  ;;  %v774_v16 = vmul.f32 %v2018_v33, %v1983_v14 }
  0xc2   : > { %468 = vrot.lane.b32.xlu0 %v1911_v51, %s1686_s15  ;;  %2887 = vst [vmem:[#allocation6_spill] sm:$0xff] %v1938_v61  ;;  %v775_v40 = vmul.f32 %v2018_v33, %v1991_v17  ;;  %v768_v55 = vmul.f32 %v1872_v28, %v1938_v61  ;;  %vm2051_vm6 = vcmp.ge.s32.totalorder %v449_v50, 1  ;;  %vm2079_vm9 = vcmp.le.s32.totalorder %v449_v50, 14 }
  0xc3   : > { %v2011_v31 = vpop.permute.xlu1 %730  ;;  %v2896_v6 = vmov 0 }
  0xc4   : > { %v410_v21 = vpop.f32.mrf.mxu2  ;;  %2888 = vst [vmem:[#allocation7_spill] sm:$0xff] %v2011_v31  ;;  %v2897_v6 = vsel %vm2079_vm9, 4294967295, %v2896_v6 }
  0xc5   : > { %v411_v22 = vadd.f32 %v410_v21, %v325_v56  ;;  %2898 = vst [vmem:[#allocation9_spill] sm:$0xff] %v2897_v6 }
  0xc6   : > { %v498_v58 = vpop.permute.xlu0 %497 }
  0xc7   : > { %v2003_v30 = vsel %vm426_vm2, %v411_v22, 0.0 }
  0xc9   : > { %458 = vrot.lane.b32.xlu2 %v1915_v52, %s1686_s15  ;;  %789 = vrot.lane.b32.xlu1 %v765_v57, %s1687_s16 }
  0xca   : > { %654 = vrot.lane.b32.xlu0 %v1932_v59, %s1687_s16 }
  0xcc   : > { %v2020_v36 = vpop.permute.xlu1 %758 }
  0xcd   : > { %v771_v37 = vmul.f32 %v2020_v36, %v1952_v4  ;;  %v772_v21 = vmul.f32 %v2020_v36, %v1888_v43 }
  0xd1   : > { %563 = vrot.lane.b32.xlu2 %v1915_v52, %s1685_s12  ;;  %565 = vrot.lane.b32.xlu1 %v1938_v61, %s1685_s12 }
  0xd2   : > { %575 = vrot.lane.b32.xlu0 %v1888_v43, %s1685_s12 }
  0xd9   : > { %791 = vrot.lane.b32.xlu2 %v766_v2, %s1687_s16  ;;  %650 = vrot.lane.b32.xlu1 %v1938_v61, %s1687_s16 }
  0xda   : > { %462 = vrot.lane.b32.xlu0 %v1952_v4, %s1686_s15 }
  0xe1   : > { %573 = vrot.lane.b32.xlu2 %v1911_v51, %s1685_s12  ;;  %470 = vrot.lane.b32.xlu1 %v1888_v43, %s1686_s15 }
  0xe2   : > { %913 = vrot.lane.b32.xlu0 %v1952_v4, %s1688_s17 }
  0xe9   : > { %652 = vrot.lane.b32.xlu2 %v1911_v51, %s1687_s16  ;;  %915 = vrot.lane.b32.xlu1 %v1888_v43, %s1688_s17 }
  0xea   : > { %660 = vrot.lane.b32.xlu0 %v1971_v10, %s1687_s16 }
  0xf1   : > { %460 = vrot.lane.b32.xlu2 %v1938_v61, %s1686_s15  ;;  %656 = vrot.lane.b32.xlu1 %v1952_v4, %s1687_s16 }
  0xf2   : > { %569 = vrot.lane.b32.xlu0 %v1983_v14, %s1685_s12 }
  0xf9   : > { %658 = vrot.lane.b32.xlu2 %v1888_v43, %s1687_s16  ;;  %577 = vrot.lane.b32.xlu1 %v1991_v17, %s1685_s12 }
  0xfa   : > { %919 = vrot.lane.b32.xlu0 %v1983_v14, %s1688_s17 }
 0x101   : > { %567 = vrot.lane.b32.xlu2 %v1952_v4, %s1685_s12  ;;  %921 = vrot.lane.b32.xlu1 %v1991_v17, %s1688_s17 }
 0x102   : > { %666 = vrot.lane.b32.xlu0 %v2003_v30, %s1687_s16 }
 0x109   : > { %917 = vrot.lane.b32.xlu2 %v1971_v10, %s1688_s17  ;;  %464 = vrot.lane.b32.xlu1 %v1983_v14, %s1686_s15 }
 0x10a   : > { %512 = vperm.xlu0 %1563, %v1833_v18  }
 0x111   : > { %472 = vrot.lane.b32.xlu2 %v1991_v17, %s1686_s15  ;;  %662 = vrot.lane.b32.xlu1 %v1983_v14, %s1687_s16 }
 0x112   : > { %801 = vrot.lane.b32.xlu0 %v771_v37, %s1687_s16 }
 0x113   : > { %v467_v39 = vpop.permute.xlu2 %466 }
 0x119   : > { %664 = vrot.lane.b32.xlu2 %v1991_v17, %s1687_s16  ;;  %1019 = vperm.xlu1 %1564, %v1833_v18  }
 0x11a   : > { %809 = vrot.lane.b32.xlu0 %v775_v40, %s1687_s16 }
 0x11b   : > { %v2037_v46 = vpop.permute.xlu2 %646 }
 0x121   : > { %793 = vrot.lane.b32.xlu2 %v767_v53, %s1687_s16  ;;  %795 = vrot.lane.b32.xlu1 %v768_v55, %s1687_s16 }
 0x122   : > { %1565 = vset.pattern.permute.xlu1 %v2870_v38  ;;  %v550_v38 = vmul.f32 %v1870_v27, %v1911_v51 }
 0x123   : > { %v459_v54 = vpop.permute.xlu2 %458 }
 0x124   : > { %v475_v60 = vsel %vm474_vm4, %v459_v54, %v467_v39  ;;  %v479_v63 = vsel %vm474_vm4, %v467_v39, %v459_v54  ;;  %v2893_v39 = vmov 0 }
 0x125   : > { %v487_v1 = vsel %vm2047_vm5, %v479_v63, 0.0  ;;  %v488_v2 = vsel %vm2051_vm6, %v475_v60, 0.0  ;;  %v2894_v39 = vsel %vm2075_vm8, 4294967295, %v2893_v39 }
 0x126   : > { %v515_v11 = vmul.f32 %v498_v58, %v487_v1  ;;  %v516_v12 = vmul.f32 %v498_v58, %v488_v2  ;;  %2895 = vst [vmem:[#allocation8_spill] sm:$0xff] %v2894_v39 }
 0x128   : > { %v555_v22 = vadd.f32 %v547_v7, %v515_v11  ;;  %v556_v37 = vadd.f32 %v548_v8, %v516_v12 }
 0x129   : > { %807 = vrot.lane.b32.xlu2 %v774_v16, %s1687_s16  ;;  %803 = vrot.lane.b32.xlu1 %v772_v21, %s1687_s16  ;;  %v1028_v21 = vmul.f32 %v1876_v32, %v1952_v4 }
 0x12b   : > { %v572_v40 = vpop.permute.xlu1 %571  ;;  %v564_v42 = vpop.permute.xlu2 %563 }
 0x12c   : > { %v580_v43 = vsel %vm579_vm7, %v564_v42, %v572_v40  ;;  %v584_v53 = vsel %vm579_vm7, %v572_v40, %v564_v42  ;;  %v2087_v55 = vpop.permute.xlu0 %648 }
 0x12d   : > { %v592_v49 = vsel %vm2075_vm8, %v580_v43, 0.0  ;;  %v593_v54 = vsel %vm2079_vm9, %v584_v53, 0.0 }
 0x12e   : > { %v616_v50 = vmul.f32 %v1874_v29, %v592_v49  ;;  %v617_v58 = vmul.f32 %v1874_v29, %v593_v54  ;;  %v2868_v29 = vmov 6   ;;  %v2872_v54 = vmov 8  }
 0x130   : > { %v2095_v60 = vadd.f32 %v616_v50, %v555_v22  ;;  %v2097_v63 = vadd.f32 %v617_v58, %v556_v37 }
 0x131   : > { %923 = vrot.lane.b32.xlu2 %v2003_v30, %s1688_s17  ;;  %878 = vperm.xlu1 %1565, %v1791_v0  }
 0x133   : > { %v645_v1 = vpop.permute.xlu1 %644  ;;  %v2102_v2 = vpop.permute.xlu2 %791 }
 0x134   : > { %v469_v7 = vpop.permute.xlu0 %468  ;;  %v2106_v8 = vsel %vm668_vm10, %v645_v1, %v2037_v46 }
 0x139   : > { %882 = vperm.xlu2 %1566, %v1833_v18   ;;  %1567 = vset.pattern.permute.xlu1 %v2868_v29 }
 0x13a   : > { %983 = vperm.xlu1 %1567, %v1791_v0  }
 0x13b   : > { %v574_v11 = vpop.permute.xlu2 %573  ;;  %v2111_v12 = vpop.permute.xlu1 %789 }
 0x13c   : > { %v2113_v16 = vpop.permute.xlu0 %654 }
 0x141   : > { %1568 = vset.pattern.permute.xlu2 %v2868_v29  ;;  %v549_v29 = vmul.f32 %v1870_v27, %v1938_v61 }
 0x142   : > { %987 = vperm.xlu2 %1568, %v1833_v18   ;;  %1058 = vrot.lane.b32.xlu1 %v1028_v21, %s1688_s17 }
 0x143   : > { %v2120_v22 = vpop.permute.xlu2 %652  ;;  %v566_v37 = vpop.permute.xlu1 %565  ;;  %1572 = vset.pattern.permute.xlu1 %v2874_v20 }
 0x144   : > { %v581_v40 = vsel %vm579_vm7, %v566_v37, %v574_v11  ;;  %v585_v42 = vsel %vm579_vm7, %v574_v11, %v566_v37  ;;  %v576_v43 = vpop.permute.xlu0 %575 }
 0x145   : > { %v594_v11 = vsel %vm2075_vm8, %v581_v40, 0.0  ;;  %v595_v21 = vsel %vm2079_vm9, %v585_v42, 0.0 }
 0x146   : > { %v618_v40 = vmul.f32 %v1864_v24, %v594_v11  ;;  %v619_v42 = vmul.f32 %v1864_v24, %v595_v21 }
 0x14a   : > { %1060 = vrot.lane.b32.xlu2 %v1904_v47, %s1688_s17 }
 0x14b   : > { %v461_v53 = vpop.permute.xlu2 %460  ;;  %v2129_v49 = vpop.permute.xlu1 %650  ;;  %1569 = vset.pattern.permute.xlu2 %v2872_v54 }
 0x14c   : > { %v476_v50 = vsel %vm474_vm4, %v461_v53, %v469_v7  ;;  %v480_v58 = vsel %vm474_vm4, %v469_v7, %v461_v53  ;;  %v463_v1 = vpop.permute.xlu0 %462 }
 0x14d   : > { %v489_v47 = vsel %vm2047_vm5, %v480_v58, 0.0  ;;  %v490_v37 = vsel %vm2051_vm6, %v476_v50, 0.0 }
 0x14e   : > { %v517_v7 = vmul.f32 %v1940_v62, %v489_v47  ;;  %v518_v53 = vmul.f32 %v1940_v62, %v490_v37  ;;  %v2899_v47 = vmov 0  }
 0x150   : > { %v557_v54 = vadd.f32 %v549_v29, %v517_v7  ;;  %v558_v20 = vadd.f32 %v550_v38, %v518_v53 }
 0x152   : > { %1135 = vperm.xlu2 %1569, %v1791_v0   ;;  %v2153_v58 = vadd.f32 %v618_v40, %v557_v54  ;;  %v2155_v50 = vadd.f32 %v619_v42, %v558_v20  ;;  %v551_v20 = vmul.f32 %v1862_v23, %v1952_v4 }
 0x153   : > { %v2157_v3 = vpop.permute.xlu2 %658  ;;  %v471_v31 = vpop.permute.xlu1 %470 }
 0x154   : > { %v477_v27 = vsel %vm474_vm4, %v463_v1, %v471_v31  ;;  %v481_v62 = vsel %vm474_vm4, %v471_v31, %v463_v1  ;;  %v2163_v11 = vpop.permute.xlu0 %913 }
 0x155   : > { %v491_v24 = vsel %vm2047_vm5, %v481_v62, 0.0  ;;  %v492_v0 = vsel %vm2051_vm6, %v477_v27, 0.0 }
 0x156   : > { %v519_v38 = vmul.f32 %v1866_v25, %v491_v24  ;;  %v520_v29 = vmul.f32 %v1866_v25, %v492_v0  ;;  %v1160_v24 = vld [vmem:[%s2864_s4 + $0x10] sm:$0xff] }
 0x158   : > { %v559_v54 = vadd.f32 %v551_v20, %v519_v38  ;;  %v560_v21 = vadd.f32 %v1908_v48, %v520_v29 }
 0x15a   : > { %903 = vrot.lane.b32.xlu2 %v1886_v41, %s1688_s17 }
 0x15b   : > { %v568_v31 = vpop.permute.xlu2 %567  ;;  %v2176_v1 = vpop.permute.xlu1 %915  ;;  %1570 = vset.pattern.permute.xlu2 %v2899_v47 }
 0x15c   : > { %v582_v37 = vsel %vm579_vm7, %v568_v31, %v576_v43  ;;  %v586_v23 = vsel %vm579_vm7, %v576_v43, %v568_v31  ;;  %v2183_v4 = vpop.permute.xlu0 %660  ;;  %v2900_v31 = vmov 7  }
 0x15d   : > { %v596_v25 = vsel %vm2075_vm8, %v582_v37, 0.0  ;;  %v597_v48 = vsel %vm2079_vm9, %v586_v23, 0.0 }
 0x15e   : > { %v620_v7 = vmul.f32 %v1979_v13, %v596_v25  ;;  %v621_v53 = vmul.f32 %v1979_v13, %v597_v48  ;;  %v2221_v25 = vsel %vm668_vm10, %v2129_v49, %v2120_v22 }
 0x160   : > { %v2191_v40 = vadd.f32 %v620_v7, %v559_v54  ;;  %v2193_v42 = vadd.f32 %v621_v53, %v560_v21  ;;  %v2209_v54 = vsel %vm668_vm10, %v2037_v46, %v2087_v55 }
 0x162   : > { %907 = vrot.lane.b32.xlu2 %v1938_v61, %s1688_s17 }
 0x163   : > { %v657_v43 = vpop.permute.xlu1 %656  ;;  %v918_v62 = vpop.permute.xlu2 %917 }
 0x164   : > { %v570_v27 = vpop.permute.xlu0 %569 }
 0x16a   : > { %1174 = vperm.xlu2 %1570, %v1160_v24  }
 0x16b   : > { %v578_v0 = vpop.permute.xlu1 %577  ;;  %v473_v29 = vpop.permute.xlu2 %472 }
 0x16c   : > { %v583_v20 = vsel %vm579_vm7, %v570_v27, %v578_v0  ;;  %v587_v13 = vsel %vm579_vm7, %v578_v0, %v570_v27  ;;  %v2204_v38 = vpop.permute.xlu0 %919  ;;  %v553_v0 = vmul.f32 %v1967_v9, %v1983_v14 }
 0x16d   : > { %v598_v53 = vsel %vm2075_vm8, %v583_v20, 0.0  ;;  %v599_v27 = vsel %vm2079_vm9, %v587_v13, 0.0 }
 0x16e   : > { %v622_v41 = vmul.f32 %v1880_v35, %v598_v53  ;;  %v623_v20 = vmul.f32 %v1880_v35, %v599_v27  ;;  %v672_v27 = vsel %vm668_vm10, %v2120_v22, %v2113_v16  ;;  %v2902_v16 = vmov 5  }
 0x172   : > { %693 = vrot.lane.b32.xlu2 %v2209_v54, %s1686_s15 }
 0x173   : > { %v2213_v21 = vpop.permute.xlu1 %921  ;;  %1573 = vset.pattern.permute.xlu2 %v2900_v31  ;;  %v2216_v23 = vpop.permute.xlu2 %664  ;;  %v554_v31 = vmul.f32 %v1967_v9, %v1991_v17 }
 0x174   : > { %v667_v37 = vpop.permute.xlu0 %666 }
 0x17a   : > { %687 = vrot.lane.b32.xlu2 %v2221_v25, %s1686_s15 }
 0x17b   : > { %v465_v46 = vpop.permute.xlu1 %464  ;;  %v2250_v61 = vpop.permute.xlu2 %793 }
 0x17c   : > { %v478_v55 = vsel %vm474_vm4, %v465_v46, %v473_v29  ;;  %v482_v48 = vsel %vm474_vm4, %v473_v29, %v465_v46  ;;  %v513_v7 = vpop.permute.xlu0 %512 }
 0x17d   : > { %v493_v49 = vsel %vm2047_vm5, %v482_v48, 0.0  ;;  %v494_v24 = vsel %vm2051_vm6, %v478_v55, 0.0  ;;  %v673_v48 = vsel %vm668_vm10, %v657_v43, %v2157_v3 }
 0x17e   : > { %v521_v29 = vmul.f32 %v513_v7, %v493_v49  ;;  %v522_v46 = vmul.f32 %v513_v7, %v494_v24  ;;  %v931_v7 = vsel %vm925_vm11, %v2176_v1, %v918_v62  ;;  %v776_v24 = vmul.f32 %v2018_v33, %v2003_v30 }
 0x180   : > { %v561_v6 = vadd.f32 %v553_v0, %v521_v29  ;;  %v562_v13 = vadd.f32 %v554_v31, %v522_v46  ;;  %v674_v0 = vsel %vm668_vm10, %v2157_v3, %v2183_v4  ;;  %v930_v31 = vsel %vm925_vm11, %v2163_v11, %v2176_v1 }
 0x182   : > { %v2245_v39 = vadd.f32 %v622_v41, %v561_v6  ;;  %v2247_v55 = vadd.f32 %v623_v20, %v562_v13  ;;  %841 = vrot.lane.b32.xlu2 %v673_v48, %s1685_s12  ;;  %v1030_v13 = vmul.f32 %v1876_v32, %v1971_v10 }
 0x183   : > { %v663_v9 = vpop.permute.xlu1 %662  ;;  %v2261_v6 = vpop.permute.xlu2 %807 }
 0x184   : > { %v675_v3 = vsel %vm668_vm10, %v663_v9, %v2216_v23 }
 0x18a   : > { %954 = vrot.lane.b32.xlu2 %v931_v7, %s1686_s15 }
 0x18b   : > { %v2255_v35 = vpop.permute.xlu1 %1019  ;;  %v924_v62 = vpop.permute.xlu2 %923 }
 0x18c   : > { %v1031_v43 = vmul.f32 %v2255_v35, %v1983_v14  ;;  %v1032_v41 = vmul.f32 %v2255_v35, %v1991_v17  ;;  %v676_v14 = vsel %vm668_vm10, %v2216_v23, %v667_v37  ;;  %v1161_v17 = vld [vmem:[%s2864_s4 + $0x18] sm:$0xff]  ;;  %v2901_v37 = vmov 8  }
 0x18d   : > { %v933_v1 = vsel %vm925_vm11, %v2213_v21, %v924_v62  ;;  %v2903_v23 = vmov 6   ;;  %v1033_v9 = vmul.f32 %v2255_v35, %v2003_v30 }
 0x18e   : > { %1066 = vrot.lane.b32.xlu1 %v1032_v41, %s1688_s17  ;;  %1064 = vrot.lane.b32.xlu0 %v1031_v43, %s1688_s17 }
 0x192   : > { %1106 = vrot.lane.b32.xlu2 %v931_v7, %s1685_s12  ;;  %v2349_v7 = vpop.permute.xlu0 %801 }
 0x193   : > { %v2278_v53 = vpop.permute.xlu2 %882  ;;  %v2327_v4 = vpop.permute.xlu1 %795 }
 0x196   : > { %901 = vrot.lane.b32.xlu1 %v1915_v52, %s1688_s17  ;;  %909 = vrot.lane.b32.xlu0 %v1911_v51, %s1688_s17 }
 0x19a   : > { %699 = vrot.lane.b32.xlu2 %v676_v14, %s1686_s15 }
 0x19b   : > { %v2332_v46 = vpop.permute.xlu1 %803 }
 0x19c   : > { %v2289_v49 = vpop.permute.xlu2 %987 }
 0x19e   : > { %905 = vrot.lane.b32.xlu1 %v1892_v44, %s1688_s17  ;;  %1179 = vperm.xlu0 %1563, %v1161_v17  }
 0x1a2   : > { %851 = vrot.lane.b32.xlu2 %v676_v14, %s1685_s12 }
 0x1a4   : > { %v2298_v22 = vpop.permute.xlu2 %1060 }
 0x1a6   : > { %911 = vrot.lane.b32.xlu1 %v1932_v59, %s1688_s17  ;;  %695 = vrot.lane.b32.xlu0 %v672_v27, %s1686_s15 }
 0x1a7   : > { %1571 = vset.pattern.permute.xlu0 %v2901_v37 }
 0x1aa   : > { %1011 = vperm.xlu2 %1573, %v1808_v5  }
 0x1ac   : > { %v2312_v33 = vpop.permute.xlu2 %1135 }
 0x1ae   : > { %685 = vrot.lane.b32.xlu1 %v2106_v8, %s1686_s15  ;;  %689 = vrot.lane.b32.xlu0 %v673_v48, %s1686_s15 }
 0x1b2   : > { %811 = vrot.lane.b32.xlu2 %v776_v24, %s1687_s16 }
 0x1b3   : > { %1575 = vset.pattern.permute.xlu2 %v2902_v16 }
 0x1b4   : > { %v904_v11 = vpop.permute.xlu2 %903 }
 0x1b6   : > { %697 = vrot.lane.b32.xlu1 %v674_v0, %s1686_s15  ;;  %946 = vrot.lane.b32.xlu0 %v930_v31, %s1686_s15 }
 0x1ba   : > { %837 = vrot.lane.b32.xlu2 %v2106_v8, %s1685_s12  ;;  %v932_v8 = vsel %vm925_vm11, %v2204_v38, %v2213_v21  ;;  %v773_v38 = vmul.f32 %v2020_v36, %v1971_v10  ;;  %v2340_v21 = vpop.permute.xlu1 %878  ;;  %v769_v10 = vmul.f32 %v1872_v28, %v1911_v51  ;;  %v2361_v36 = vpop.permute.xlu0 %809 }
 0x1bc   : > { %v908_v29 = vpop.permute.xlu2 %907 }
 0x1be   : > { %849 = vrot.lane.b32.xlu1 %v674_v0, %s1685_s12  ;;  %1098 = vrot.lane.b32.xlu0 %v930_v31, %s1685_s12 }
 0x1c2   : > { %847 = vrot.lane.b32.xlu2 %v672_v27, %s1685_s12 }
 0x1c4   : > { %v2334_v20 = vpop.permute.xlu2 %1174 }
 0x1c6   : > { %691 = vrot.lane.b32.xlu1 %v675_v3, %s1686_s15  ;;  %843 = vrot.lane.b32.xlu0 %v675_v3, %s1685_s12 }
 0x1ca   : > { %874 = vperm.xlu2 %1575, %v1808_v5  }
 0x1cc   : > { %v694_v48 = vpop.permute.xlu2 %693 }
 0x1ce   : > { %948 = vrot.lane.b32.xlu1 %v932_v8, %s1686_s15  ;;  %956 = vrot.lane.b32.xlu0 %v933_v1, %s1686_s15 }
 0x1d2   : > { %1577 = vset.pattern.permute.xlu2 %v2903_v23 }
 0x1d4   : > { %v688_v32 = vpop.permute.xlu2 %687 }
 0x1d6   : > { %1100 = vrot.lane.b32.xlu1 %v932_v8, %s1685_s12  ;;  %1108 = vrot.lane.b32.xlu0 %v933_v1, %s1685_s12 }
 0x1dc   : > { %v2365_v35 = vpop.permute.xlu2 %841 }
 0x1de   : > { %1007 = vperm.xlu1 %1572, %v1821_v15   ;;  %1139 = vperm.xlu0 %1571, %v1833_v18   ;;  %v2351_v18 = vpop.permute.xlu1 %983 }
 0x1e4   : > { %v2372_v41 = vpop.permute.xlu2 %954 }
 0x1e6   : > { %805 = vrot.lane.b32.xlu1 %v773_v38, %s1687_s16  ;;  %1062 = vrot.lane.b32.xlu0 %v1030_v13, %s1688_s17  ;;  %v2363_v30 = vpop.permute.xlu1 %1058 }
 0x1e7   : > { %1574 = vset.pattern.permute.xlu1 %v2902_v16 }
 0x1ec   : > { %v2379_v27 = vpop.permute.xlu2 %1106 }
 0x1ee   : > { %1068 = vrot.lane.b32.xlu1 %v1033_v9, %s1688_s17  ;;  %839 = vrot.lane.b32.xlu0 %v2221_v25, %s1685_s12 }
 0x1f6   : > { %845 = vrot.lane.b32.xlu1 %v2209_v54, %s1685_s12  ;;  %797 = vrot.lane.b32.xlu0 %v769_v10, %s1687_s16 }
 0x1fe   : > { %870 = vperm.xlu1 %1574, %v1821_v15  }
 0x200   : > { %v2368_v43 = vpop.permute.xlu0 %1064  ;;  %v2370_v25 = vpop.permute.xlu1 %1066 }
 0x206   : > { %1576 = vset.pattern.permute.xlu1 %v2903_v23 }
 0x208   : > { %v910_v62 = vpop.permute.xlu0 %909  ;;  %v902_v54 = vpop.permute.xlu1 %901 }
 0x209   : > { %v928_v14 = vsel %vm925_vm11, %v908_v29, %v910_v62  ;;  %v926_v17 = vsel %vm925_vm11, %v902_v54, %v904_v11  ;;  %v2391_v29 = vpop.permute.xlu2 %699 }
 0x20a   : > { %944 = vrot.lane.b32.xlu1 %v928_v14, %s1686_s15  ;;  %942 = vrot.lane.b32.xlu0 %v926_v17, %s1686_s15 }
 0x210   : > { %v2381_v24 = vpop.permute.xlu0 %1179  ;;  %v906_v16 = vpop.permute.xlu1 %905 }
 0x211   : > { %v927_v0 = vsel %vm925_vm11, %v904_v11, %v906_v16 }
 0x212   : > { %975 = vperm.xlu1 %1576, %v1821_v15   ;;  %950 = vrot.lane.b32.xlu2 %v927_v0, %s1686_s15 }
 0x218   : > { %v696_v31 = vpop.permute.xlu0 %695  ;;  %v912_v3 = vpop.permute.xlu1 %911 }
 0x219   : > { %v702_v8 = vsel %vm474_vm4, %v688_v32, %v696_v31  ;;  %v706_v1 = vsel %vm474_vm4, %v696_v31, %v688_v32  ;;  %v929_v23 = vsel %vm925_vm11, %v910_v62, %v912_v3  ;;  %v852_v31 = vpop.permute.xlu2 %851 }
 0x21a   : > { %v711_v38 = vsel %vm2047_vm5, %v706_v1, 0.0  ;;  %v712_v15 = vsel %vm2051_vm6, %v702_v8, 0.0  ;;  %1096 = vrot.lane.b32.xlu1 %v928_v14, %s1685_s12  ;;  %979 = vperm.xlu2 %1577, %v1808_v5   ;;  %v813_v8 = vsel %vm668_vm10, %v2111_v12, %v2102_v2 }
 0x21b   : > { %v735_v11 = vmul.f32 %v1993_v19, %v711_v38  ;;  %v736_v13 = vmul.f32 %v1993_v19, %v712_v15  ;;  %952 = vrot.lane.b32.xlu0 %v929_v23, %s1686_s15  ;;  %1579 = vset.pattern.permute.xlu1 %v2899_v47  ;;  %s1357_s15 = scalar_lea.sflag [#allocation3], %s283_s19 }
 0x21d   : > { %v2404_v9 = vadd.f32 %v735_v11, %v2153_v58  ;;  %v2407_v32 = vadd.f32 %v736_v13, %v2155_v50 }
 0x220   : > { %v690_v10 = vpop.permute.xlu0 %689  ;;  %v686_v62 = vpop.permute.xlu1 %685 }
 0x221   : > { %v701_v54 = vsel %vm474_vm4, %v686_v62, %v694_v48  ;;  %v705_v14 = vsel %vm474_vm4, %v694_v48, %v686_v62  ;;  %v2457_v62 = vpop.permute.xlu2 %1011 }
 0x222   : > { %v709_v19 = vsel %vm2047_vm5, %v705_v14, 0.0  ;;  %v710_v16 = vsel %vm2051_vm6, %v701_v54, 0.0  ;;  %1102 = vrot.lane.b32.xlu2 %v927_v0, %s1685_s12  ;;  %v814_v0 = vsel %vm668_vm10, %v2102_v2, %v2250_v61 }
 0x223   : > { %v733_v58 = vmul.f32 %v1868_v26, %v709_v19  ;;  %v734_v50 = vmul.f32 %v1868_v26, %v710_v16  ;;  %1094 = vrot.lane.b32.xlu0 %v926_v17, %s1685_s12  ;;  %1578 = vset.pattern.permute.xlu2 %v2901_v37 }
 0x225   : > { %v741_v3 = vadd.f32 %v733_v58, %v2095_v60  ;;  %v742_v48 = vadd.f32 %v734_v50, %v2097_v63 }
 0x227   : > { %v2430_v1 = vadd.f32 %v814_v0, %v742_v48  ;;  %v2432_v26 = vadd.f32 %v813_v8, %v741_v3 }
 0x228   : > { %v947_v17 = vpop.permute.xlu0 %946  ;;  %v698_v38 = vpop.permute.xlu1 %697 }
 0x229   : > { %v2437_v60 = vsel %vm474_vm4, %v947_v17, %v2372_v41  ;;  %v703_v63 = vsel %vm474_vm4, %v690_v10, %v698_v38  ;;  %v707_v12 = vsel %vm474_vm4, %v698_v38, %v690_v10  ;;  %v817_v10 = vsel %vm668_vm10, %v2349_v7, %v2332_v46 }
 0x22a   : > { %v713_v61 = vsel %vm2047_vm5, %v707_v12, 0.0  ;;  %v714_v2 = vsel %vm2051_vm6, %v703_v63, 0.0  ;;  %v964_v54 = vsel %vm474_vm4, %v2372_v41, %v947_v17  ;;  %v1074_v38 = vsel %vm925_vm11, %v2363_v30, %v2298_v22 }
 0x22b   : > { %v737_v37 = vmul.f32 %v1898_v45, %v713_v61  ;;  %v738_v15 = vmul.f32 %v1898_v45, %v714_v2  ;;  %1104 = vrot.lane.b32.xlu0 %v929_v23, %s1685_s12  ;;  %v2904_v23 = vld [vmem:[#allocation6_spill] sm:$0xff]  ;;  %v970_v41 = vsel %vm2047_vm5, %v964_v54, 0.0  ;;  %s1374_s12 = sshll.u32 %s1370_s30, 4  ;;  %s1375_s12 = int_to_ptr.hbm [resolvable:$true] %s1374_s12 }
 0x22c   : > { %v994_v48 = vmul.f32 %v2351_v18, %v970_v41  ;;  %s1613_s27 = sshra.s32 %s1375_s12, 4  ;;  %s1614_s27 = int_to_ptr.hbm [resolvable:$true] %s1613_s27 }
 0x22d   : > { %v745_v11 = vadd.f32 %v737_v37, %v2191_v40  ;;  %v2452_v13 = vadd.f32 %v738_v15, %v2193_v42  ;;  %v1025_v40 = vmul.f32 %v2457_v62, %v2904_v23  ;;  %s1615_s18 = scalar_lea.hbm %s1614_s27, 8  ;;  %p1620_p1 = scmp.lt.s32.totalorder %s1614_s27, %s2867_s7 }
 0x22e   : > { %p1616_p12 = scmp.ne.s32.totalorder %s1614_s27, %s1615_s18  ;;  %p1621_p2 = scmp.lt.s32.totalorder %s1619_s20, %s1615_s18 }
 0x22f   : > { %v833_v14 = vadd.f32 %v817_v10, %v745_v11  ;;  %v812_v10 = vpop.permute.xlu2 %811 }
 0x230   : > { %v1099_v19 = vpop.permute.xlu0 %1098  ;;  %v2462_v45 = vpop.permute.xlu1 %849  ;;  %p1617_p13 = pnand %p1616_p12, %p1773_p4  ;;  %p1622_p3 = por %p1621_p2, %p1620_p1 }
 0x231   : > { %v2469_v42 = vsel %vm579_vm7, %v2379_v27, %v1099_v19  ;;  %v855_v7 = vsel %vm579_vm7, %v2365_v35, %v2462_v45  ;;  %v1112_v3 = vsel %vm579_vm7, %v1099_v19, %v2379_v27 }
 0x232   : > { %v865_v58 = vsel %vm2075_vm8, %v855_v7, 0.0  ;;  %v1122_v0 = vsel %vm2075_vm8, %v1112_v3, 0.0  ;;  %p1618_p0 = pneg %p1617_p13 }
 0x233   : > { %v889_v50 = vmul.f32 %v2340_v21, %v865_v58  ;;  %1052 = vrot.lane.b32.xlu0 %v1025_v40, %s1688_s17  ;;  %v1146_v37 = vmul.f32 %v2312_v33, %v1122_v0  ;;  %v820_v58 = vsel %vm668_vm10, %v2361_v36, %v812_v10 }
 0x234   : > { %p1623_p5 = pnand %p1622_p3, %p1618_p0 }
 0x235   : > { %v897_v8 = vadd.f32 %v889_v50, %v833_v14  ;;  %v2906_v14 = vld [vmem:[#allocation7_spill] sm:$0xff] }
 0x237   : > { %v1002_v17 = vadd.f32 %v994_v48, %v897_v8 }
 0x238   : > { %v844_v63 = vpop.permute.xlu0 %843  ;;  %v692_v12 = vpop.permute.xlu1 %691 }
 0x239   : > { %v1090_v61 = vadd.f32 %v1074_v38, %v1002_v17  ;;  %v860_v2 = vsel %vm579_vm7, %v852_v31, %v844_v63  ;;  %v704_v27 = vsel %vm474_vm4, %v692_v12, %v2391_v29  ;;  %v856_v15 = vsel %vm579_vm7, %v844_v63, %v852_v31 }
 0x23a   : > { %v708_v11 = vsel %vm474_vm4, %v2391_v29, %v692_v12  ;;  %v716_v30 = vsel %vm2051_vm6, %v704_v27, 0.0  ;;  %v868_v40 = vsel %vm2079_vm9, %v860_v2, 0.0  ;;  %v867_v29 = vsel %vm2075_vm8, %v856_v15, 0.0 }
 0x23b   : > { %v715_v54 = vsel %vm2047_vm5, %v708_v11, 0.0  ;;  %v740_v19 = vmul.f32 %v2906_v14, %v716_v30  ;;  %1131 = vperm.xlu0 %1571, %v1808_v5   ;;  %v2510_v7 = vadd.f32 %v1146_v37, %v1090_v61  ;;  %v819_v5 = vsel %vm668_vm10, %v2261_v6, %v2361_v36 }
 0x23c   : > { %v739_v31 = vmul.f32 %v2906_v14, %v715_v54  ;;  %v892_v3 = vmul.f32 %v2278_v53, %v868_v40  ;;  %v891_v8 = vmul.f32 %v2278_v53, %v867_v29  ;;  %v1076_v15 = vsel %vm925_vm11, %v2368_v43, %v2370_v25  ;;  %v2908_v29 = vld [vmem:[#allocation5_spill] sm:$0xff] }
 0x23d   : > { %v748_v41 = vadd.f32 %v740_v19, %v2247_v55  ;;  %v1027_v55 = vmul.f32 %v2457_v62, %v1932_v59  ;;  %v859_v43 = vsel %vm579_vm7, %v2462_v45, %v2365_v35  ;;  %v1598_v35 = vld [vmem:[%s2863_s3] sm:$0xff] }
 0x23e   : > { %v747_v50 = vadd.f32 %v739_v31, %v2245_v39 }
 0x23f   : > { %v836_v48 = vadd.f32 %v820_v58, %v748_v41 }
 0x240   : > { %v835_v0 = vadd.f32 %v819_v5, %v747_v50  ;;  %v957_v17 = vpop.permute.xlu0 %956  ;;  %v949_v38 = vpop.permute.xlu1 %948  ;;  %v866_v50 = vsel %vm2079_vm9, %v859_v43, 0.0 }
 0x241   : > { %v961_v63 = vsel %vm474_vm4, %v949_v38, %v957_v17  ;;  %v965_v39 = vsel %vm474_vm4, %v957_v17, %v949_v38  ;;  %v900_v12 = vadd.f32 %v892_v3, %v836_v48  ;;  %v1026_v3 = vmul.f32 %v2457_v62, %v1911_v51 }
 0x242   : > { %v899_v61 = vadd.f32 %v891_v8, %v835_v0  ;;  %v972_v6 = vsel %vm2047_vm5, %v965_v39, 0.0  ;;  %v973_v53 = vsel %vm2051_vm6, %v961_v63, 0.0  ;;  %v890_v8 = vmul.f32 %v2340_v21, %v866_v50  ;;  %v1159_v39 = vld [vmem:[%s2864_s4 + $0x8] sm:$0xff] }
 0x243   : > { %v996_v36 = vmul.f32 %v2289_v49, %v972_v6  ;;  %v997_v2 = vmul.f32 %v2289_v49, %v973_v53  ;;  %1056 = vrot.lane.b32.xlu0 %v1027_v55, %s1688_s17  ;;  %v770_v53 = vmul.f32 %v1872_v28, %v1932_v59  ;;  %v1313_v28 = vld [vmem:[%s2866_s6] sm:$0xf] }
 0x244   : > { %1581 = vset.pattern.permute.xlu0 %v2899_v47 }
 0x245   : > { %v1004_v27 = vadd.f32 %v996_v36, %v899_v61  ;;  %v1005_v37 = vadd.f32 %v997_v2, %v900_v12 }
 0x247   : > { %v1092_v11 = vadd.f32 %v1076_v15, %v1004_v27 }
 0x248   : > { %v1109_v30 = vpop.permute.xlu0 %1108  ;;  %v1101_v10 = vpop.permute.xlu1 %1100 }
 0x249   : > { %v1113_v54 = vsel %vm579_vm7, %v1101_v10, %v1109_v30 }
 0x24a   : > { %v1124_v49 = vsel %vm2075_vm8, %v1113_v54, 0.0 }
 0x250   : > { %v1140_v14 = vpop.permute.xlu0 %1139  ;;  %v1008_v19 = vpop.permute.xlu1 %1007 }
 0x251   : > { %v1148_v40 = vmul.f32 %v1140_v14, %v1124_v49  ;;  %v1022_v31 = vmul.f32 %v1008_v19, %v1915_v52  ;;  %v1023_v41 = vmul.f32 %v1008_v19, %v2908_v29  ;;  %v971_v52 = vsel %vm2051_vm6, %v2437_v60, 0.0 }
 0x252   : > { %v995_v51 = vmul.f32 %v2351_v18, %v971_v52  ;;  %v1123_v60 = vsel %vm2079_vm9, %v2469_v42, 0.0  ;;  %v1158_v18 = vld [vmem:[%s2864_s4] sm:$0xff]  ;;  %v1024_v36 = vmul.f32 %v1008_v19, %v1892_v44 }
 0x253   : > { %v1156_v58 = vadd.f32 %v1148_v40, %v1092_v11  ;;  %1048 = vrot.lane.b32.xlu2 %v1023_v41, %s1688_s17  ;;  %1046 = vrot.lane.b32.xlu1 %v1022_v31, %s1688_s17  ;;  %v1147_v17 = vmul.f32 %v2312_v33, %v1123_v60 }
 0x255   : > { %v2616_v15 = vadd.f32 %v2381_v24, %v1156_v58 }
 0x258   : > { %v806_v5 = vpop.permute.xlu1 %805  ;;  %v1063_v62 = vpop.permute.xlu0 %1062 }
 0x259   : > { %v818_v48 = vsel %vm668_vm10, %v2332_v46, %v806_v5  ;;  %v1117_v46 = vsel %vm579_vm7, %v1109_v30, %v1101_v10  ;;  %v2625_v10 = vmul.f32 0.70710677, %v2616_v15 }
 0x25a   : > { %v834_v0 = vadd.f32 %v818_v48, %v2452_v13  ;;  %v1075_v13 = vsel %vm925_vm11, %v2298_v22, %v1063_v62  ;;  %v1125_v63 = vsel %vm2079_vm9, %v1117_v46, 0.0 }
 0x25b   : > { %1127 = vperm.xlu2 %1578, %v1598_v35   ;;  %1054 = vrot.lane.b32.xlu1 %v1026_v3, %s1688_s17  ;;  %v1149_v12 = vmul.f32 %v1140_v14, %v1125_v63  ;;  %vm1200_vm13 = vcmp.ge.f32.partialorder %v2625_v10, 0.0 }
 0x25c   : > { %v898_v45 = vadd.f32 %v890_v8, %v834_v0 }
 0x25e   : > { %v1003_v21 = vadd.f32 %v995_v51, %v898_v45 }
 0x260   : > { %v1091_v38 = vadd.f32 %v1075_v13, %v1003_v21  ;;  %v1069_v55 = vpop.permute.xlu1 %1068  ;;  %v2646_v43 = vpop.permute.xlu0 %839 }
 0x261   : > { %v1077_v42 = vsel %vm925_vm11, %v2370_v25, %v1069_v55  ;;  %v2593_v25 = vpop.permute.xlu2 %837 }
 0x262   : > { %v1155_v22 = vadd.f32 %v1147_v17, %v1091_v38  ;;  %v1093_v61 = vadd.f32 %v1077_v42, %v1005_v37  ;;  %v2613_v37 = vadd.f32 %v2334_v20, %v2510_v7  ;;  %v2634_v7 = vand.u32 2147483647, %v2625_v10 }
 0x263   : > { %1580 = vset.pattern.permute.xlu2 %v2899_v47  ;;  %1164 = vperm.xlu1 %1579, %v1158_v18  }
 0x264   : > { %v1157_v33 = vadd.f32 %v1149_v12, %v1093_v61  ;;  %1169 = vperm.xlu2 %1580, %v1159_v39   ;;  %v2619_v11 = vmul.f32 0.70710677, %v2613_v37  ;;  %v2622_v30 = vadd.f32 %v2334_v20, %v1155_v22  ;;  %v1212_v20 = vmul.f32 0.3275911, %v2634_v7 }
 0x266   : > { %v2631_v54 = vmul.f32 0.70710677, %v2622_v30  ;;  %v1216_v29 = vadd.f32 1.0, %v1212_v20  ;;  %v2649_v50 = vadd.f32 %v2381_v24, %v1157_v33  ;;  %vm1198_vm12 = vcmp.ge.f32.partialorder %v2619_v11, 0.0 }
 0x267   : > { %v1191_v16 = vmul.f32 0.5, %v2622_v30 }
 0x268   : > { %v2587_v6 = vpop.permute.xlu1 %845  ;;  %v2640_v19 = vand.u32 2147483647, %v2631_v54  ;;  %v2652_v3 = vmul.f32 0.70710677, %v2649_v50  ;;  %v2659_v62 = vpop.permute.xlu0 %797  ;;  %vm1199_vm14 = vcmp.ge.f32.partialorder %v2631_v54, 0.0 }
 0x269   : > { %v857_v47 = vsel %vm579_vm7, %v2587_v6, %v2593_v25  ;;  %v2636_v14 = vpop.permute.xlu2 %847 }
 0x26a   : > { %v862_v2 = vsel %vm2079_vm9, %v857_v47, 0.0  ;;  %v1211_v31 = vmul.f32 0.3275911, %v2640_v19  ;;  %v2657_v35 = vand.u32 2147483647, %v2652_v3  ;;  %vm1201_vm0 = vcmp.ge.f32.partialorder %v2652_v3, 0.0 }
 0x26b   : > { %799 = vrot.lane.b32.xlu1 %v770_v53, %s1687_s16 }
 0x26c   : > { %1050 = vrot.lane.b32.xlu2 %v1024_v36, %s1688_s17  ;;  %v1215_v58 = vadd.f32 1.0, %v1211_v31  ;;  %v1213_v24 = vmul.f32 0.3275911, %v2657_v35 }
 0x26e   : > { %v1217_v17 = vadd.f32 1.0, %v1213_v24 }
 0x270   : > { %v2602_v27 = vpop.permute.xlu1 %870 }
 0x271   : > { %v886_v44 = vmul.f32 %v2602_v27, %v862_v2  ;;  %v2644_v41 = vpop.permute.xlu2 %874 }
 0x273   : > { %v2609_v59 = vadd.f32 %v886_v44, %v2430_v1  ;;  %1316 = vperm.xlu1 %1579, %v1313_v28   ;;  %v2628_v1 = vand.u32 2147483647, %v2619_v11 }
 0x275   : > { %v1210_v49 = vmul.f32 0.3275911, %v2628_v1 }
 0x277   : > { %v1214_v40 = vadd.f32 1.0, %v1210_v49 }
 0x279   : > { %1582 = vrcp.f32 %v1214_v40  ;;  %v2654_v48 = vpop.permute.xlu2 %950 }
 0x27a   : > { %1584 = vrcp.f32 %v1216_v29 }
 0x27b   : > { %1586 = vrcp.f32 %v1215_v58 }
 0x27c   : > { %v2664_v18 = vpop.permute.xlu0 %942  ;;  %1588 = vrcp.f32 %v1217_v17  ;;  %v2673_v49 = vpop.permute.xlu1 %944 }
 0x27f   : > { %v1583_v5 = vpop.eup %1582 }
 0x280   : > { %v1585_v52 = vpop.eup %1584  ;;  %v1222_v51 = vmul.f32 %v1583_v5, %v1214_v40 }
 0x281   : > { %v1587_v8 = vpop.eup %1586  ;;  %v1224_v0 = vmul.f32 %v1585_v52, %v1216_v29  ;;  %v2662_v38 = vpop.permute.xlu2 %979 }
 0x282   : > { %v1223_v45 = vmul.f32 %v1587_v8, %v1215_v58  ;;  %v1226_v46 = vsub.f32 2.0, %v1222_v51  ;;  %v1589_v53 = vpop.eup %1588  ;;  %v1270_v51 = vsub.f32 0.0, %v2628_v1 }
 0x283   : > { %v1228_v60 = vsub.f32 2.0, %v1224_v0  ;;  %v1225_v44 = vmul.f32 %v1589_v53, %v1217_v17 }
 0x284   : > { %v1227_v21 = vsub.f32 2.0, %v1223_v45  ;;  %v1230_v55 = vmul.f32 %v1583_v5, %v1226_v46  ;;  %v1272_v45 = vsub.f32 0.0, %v2634_v7  ;;  %v976_v46 = vpop.permute.xlu1 %975 }
 0x285   : > { %v1232_v13 = vmul.f32 %v1585_v52, %v1228_v60  ;;  %v1229_v29 = vsub.f32 2.0, %v1225_v44 }
 0x286   : > { %v2666_v63 = vmul.f32 %v1587_v8, %v1227_v21  ;;  %v1234_v42 = vmul.f32 1.0614054, %v1230_v55 }
 0x287   : > { %v1236_v39 = vmul.f32 1.0614054, %v1232_v13  ;;  %v2682_v60 = vmul.f32 %v1589_v53, %v1229_v29 }
 0x288   : > { %v1235_v12 = vmul.f32 1.0614054, %v2666_v63  ;;  %v1238_v22 = vadd.f32 -1.4531521, %v1234_v42  ;;  %v1274_v42 = vmul.f32 %v1270_v51, %v2628_v1 }
 0x289   : > { %v1240_v61 = vadd.f32 -1.4531521, %v1236_v39  ;;  %v2671_v36 = vpop.permute.xlu2 %1102  ;;  %v1271_v39 = vsub.f32 0.0, %v2640_v19 }
 0x28a   : > { %v1239_v47 = vadd.f32 -1.4531521, %v1235_v12  ;;  %v1242_v2 = vmul.f32 %v1238_v22, %v1230_v55  ;;  %v1276_v12 = vmul.f32 %v1272_v45, %v2634_v7  ;;  %v1237_v22 = vmul.f32 1.0614054, %v2682_v60 }
 0x28b   : > { %v1244_v28 = vmul.f32 %v1240_v61, %v1232_v13  ;;  %v1278_v53 = vmul.f32 1.442695, %v1274_v42  ;;  %v1275_v44 = vmul.f32 %v1271_v39, %v2640_v19  ;;  %v854_v39 = vsel %vm579_vm7, %v2646_v43, %v2636_v14 }
 0x28c   : > { %v1243_v20 = vmul.f32 %v1239_v47, %v2666_v63  ;;  %v1246_v40 = vadd.f32 1.4214138, %v1242_v2 }
 0x28d   : > { %v2669_v33 = vpop.permute.xlu0 %952  ;;  %v1248_v31 = vadd.f32 1.4214138, %v1244_v28  ;;  %1590 = vpow2.f32 %v1278_v53  ;;  %v1280_v7 = vmul.f32 1.442695, %v1275_v44  ;;  %v1273_v53 = vsub.f32 0.0, %v2657_v35 }
 0x28e   : > { %v1247_v52 = vadd.f32 1.4214138, %v1243_v20  ;;  %v1250_v8 = vmul.f32 %v1246_v40, %v1230_v55  ;;  %v1282_v20 = vmul.f32 1.442695, %v1276_v12  ;;  %v853_v12 = vsel %vm579_vm7, %v2593_v25, %v2587_v6 }
 0x28f   : > { %v1252_v0 = vmul.f32 %v1248_v31, %v1232_v13  ;;  %v1241_v31 = vadd.f32 -1.4531521, %v1237_v22  ;;  %v958_v6 = vsel %vm474_vm4, %v2664_v18, %v2654_v48  ;;  %v962_v25 = vsel %vm474_vm4, %v2654_v48, %v2664_v18 }
 0x290   : > { %v1251_v24 = vmul.f32 %v1247_v52, %v2666_v63  ;;  %v1254_v21 = vadd.f32 -0.28449672, %v1250_v8  ;;  %1592 = vpow2.f32 %v1282_v20  ;;  %v863_v44 = vsel %vm2075_vm8, %v854_v39, 0.0 }
 0x291   : > { %v1256_v17 = vadd.f32 -0.28449672, %v1252_v0  ;;  %v1245_v8 = vmul.f32 %v1241_v31, %v2682_v60  ;;  %v2696_v0 = vpop.permute.xlu1 %1096  ;;  %1594 = vpow2.f32 %v1280_v7  ;;  %v861_v20 = vsel %vm2075_vm8, %v853_v12, 0.0 }
 0x292   : > { %v1255_v47 = vadd.f32 -0.28449672, %v1251_v24  ;;  %v1258_v2 = vmul.f32 %v1254_v21, %v1230_v55  ;;  %v967_v7 = vsel %vm2051_vm6, %v958_v6, 0.0  ;;  %v959_v30 = vsel %vm474_vm4, %v2673_v49, %v2669_v33 }
 0x293   : > { %v1260_v28 = vmul.f32 %v1256_v17, %v1232_v13  ;;  %v1249_v21 = vadd.f32 1.4214138, %v1245_v8  ;;  %v1591_v17 = vpop.eup %1590 }
 0x294   : > { %v1259_v1 = vmul.f32 %v1255_v47, %v2666_v63  ;;  %v1262_v29 = vadd.f32 0.2548296, %v1258_v2  ;;  %v963_v47 = vsel %vm474_vm4, %v2669_v33, %v2673_v49 }
 0x295   : > { %v2678_v5 = vpop.permute.xlu0 %1094  ;;  %v1264_v52 = vadd.f32 0.2548296, %v1260_v28  ;;  %v968_v48 = vsel %vm2047_vm5, %v963_v47, 0.0 }
 0x296   : > { %v1263_v51 = vadd.f32 0.2548296, %v1259_v1  ;;  %v1266_v45 = vmul.f32 %v1262_v29, %v1230_v55  ;;  %v1593_v42 = vpop.eup %1592  ;;  %v815_v55 = vsel %vm668_vm10, %v2327_v4, %v2659_v62  ;;  %v1253_v4 = vmul.f32 %v1249_v21, %v2682_v60 }
 0x297   : > { %v1268_v24 = vmul.f32 %v1264_v52, %v1232_v13  ;;  %v831_v1 = vadd.f32 %v815_v55, %v2404_v9  ;;  %v885_v29 = vmul.f32 %v2602_v27, %v861_v20  ;;  %v966_v52 = vsel %vm2047_vm5, %v962_v25, 0.0 }
 0x298   : > { %v1267_v13 = vmul.f32 %v1263_v51, %v2666_v63  ;;  %v1286_v2 = vmul.f32 %v1591_v17, %v1266_v45  ;;  %v1595_v63 = vpop.eup %1594  ;;  %v1277_v45 = vmul.f32 %v1273_v53, %v2657_v35  ;;  %v991_v21 = vmul.f32 %v976_v46, %v967_v7 }
 0x299   : > { %v1288_v28 = vmul.f32 %v1593_v42, %v1268_v24  ;;  %v990_v24 = vmul.f32 %v976_v46, %v966_v52  ;;  %v1257_v17 = vadd.f32 -0.28449672, %v1253_v4  ;;  %v887_v9 = vmul.f32 %v2644_v41, %v863_v44 }
 0x29a   : > { %v1287_v18 = vmul.f32 %v1595_v63, %v1267_v13  ;;  %v1290_v8 = vsub.f32 1.0, %v1286_v2  ;;  %v992_v27 = vmul.f32 %v2662_v38, %v968_v48  ;;  %v1692_v42 = vmov -1.0  }
 0x29b   : > { %v1292_v51 = vsub.f32 1.0, %v1288_v28  ;;  %v1202_v56 = vsel %vm1198_vm12, 1.0, %v1692_v42  ;;  %v893_v39 = vadd.f32 %v885_v29, %v2432_v26  ;;  %v1204_v13 = vsel %vm1200_vm13, 1.0, %v1692_v42 }
 0x29c   : > { %v1203_v35 = vsel %vm1199_vm14, 1.0, %v1692_v42  ;;  %v1291_v46 = vsub.f32 1.0, %v1287_v18  ;;  %v895_v55 = vadd.f32 %v887_v9, %v831_v1  ;;  %v1294_v11 = vmul.f32 %v1290_v8, %v1202_v56 }
 0x29d   : > { %v2692_v40 = vpop.permute.xlu0 %1104  ;;  %v1296_v2 = vmul.f32 %v1292_v51, %v1204_v13  ;;  %v1284_v28 = vmul.f32 1.442695, %v1277_v45  ;;  %v998_v26 = vadd.f32 %v990_v24, %v893_v39  ;;  %v999_v53 = vadd.f32 %v991_v21, %v2609_v59 }
 0x29e   : > { %v1111_v47 = vsel %vm579_vm7, %v2696_v0, %v2692_v40  ;;  %v1261_v10 = vmul.f32 %v1257_v17, %v2682_v60  ;;  %v1110_v54 = vsel %vm579_vm7, %v2678_v5, %v2671_v36  ;;  %v1000_v63 = vadd.f32 %v992_v27, %v895_v55 }
 0x29f   : > { %v1114_v59 = vsel %vm579_vm7, %v2671_v36, %v2678_v5  ;;  %v1120_v20 = vsel %vm2075_vm8, %v1111_v47, 0.0  ;;  %v1295_v29 = vmul.f32 %v1291_v46, %v1203_v35  ;;  %v1298_v8 = vadd.f32 1.0, %v1294_v11 }
 0x2a0   : > { %v1118_v51 = vsel %vm2075_vm8, %v1110_v54, 0.0  ;;  %v1119_v36 = vsel %vm2079_vm9, %v1114_v59, 0.0  ;;  %v1265_v45 = vadd.f32 0.2548296, %v1261_v10  ;;  %1596 = vpow2.f32 %v1284_v28 }
 0x2a1   : > { %v1299_v21 = vadd.f32 1.0, %v1295_v29  ;;  %v1190_v56 = vmul.f32 0.5, %v2613_v37  ;;  %v858_v28 = vsel %vm579_vm7, %v2636_v14, %v2646_v43  ;;  %v969_v43 = vsel %vm2051_vm6, %v959_v30, 0.0 }
 0x2a2   : > { %v1269_v13 = vmul.f32 %v1265_v45, %v2682_v60  ;;  %v864_v60 = vsel %vm2079_vm9, %v858_v28, 0.0  ;;  %v1115_v3 = vsel %vm579_vm7, %v2692_v40, %v2696_v0  ;;  %v1193_v29 = vmul.f32 0.5, %v2649_v50 }
 0x2a3   : > { %v1302_v55 = vmul.f32 %v1298_v8, %v1190_v56  ;;  %v1303_v47 = vmul.f32 %v1299_v21, %v1191_v16  ;;  %v888_v33 = vmul.f32 %v2644_v41, %v864_v60  ;;  %v1121_v41 = vsel %vm2079_vm9, %v1115_v3, 0.0 }
 0x2a5   : > { %v1053_v22 = vpop.permute.xlu0 %1052 }
 0x2a6   : > { %v1597_v11 = vpop.eup %1596 }
 0x2ad   : > { %v2676_v58 = vpop.permute.xlu2 %1048  ;;  %v2759_v6 = vpop.permute.xlu0 %1131 }
 0x2ae   : > { %v1144_v48 = vmul.f32 %v2759_v6, %v1120_v20 }
 0x2b5   : > { %v2689_v61 = vpop.permute.xlu2 %1127  ;;  %v1057_v59 = vpop.permute.xlu0 %1056 }
 0x2b6   : > { %v1143_v24 = vmul.f32 %v2689_v61, %v1119_v36 }
 0x2be   : > { %v2698_v19 = vpop.permute.xlu2 %1169 }
 0x2c5   : > { %v1047_v31 = vpop.permute.xlu1 %1046 }
 0x2c6   : > { %v1051_v12 = vpop.permute.xlu2 %1050  ;;  %v1070_v25 = vsel %vm925_vm11, %v1047_v31, %v2676_v58  ;;  %v1300_v31 = vadd.f32 1.0, %v1296_v2 }
 0x2c7   : > { %v1071_v4 = vsel %vm925_vm11, %v2676_v58, %v1051_v12  ;;  %v1086_v52 = vadd.f32 %v1070_v25, %v998_v26  ;;  %v1192_v58 = vmul.f32 0.5, %v2616_v15  ;;  %v1289_v26 = vmul.f32 %v1597_v11, %v1269_v13 }
 0x2c8   : > { %v1087_v7 = vadd.f32 %v1071_v4, %v999_v53  ;;  %v1310_v53 = vld [vmem:[%s2865_s5] sm:$0x3]  ;;  %v1205_v25 = vsel %vm1201_vm0, 1.0, %v1692_v42  ;;  %v993_v4 = vmul.f32 %v2662_v38, %v969_v43 }
 0x2c9   : > { %v1304_v9 = vmul.f32 %v1300_v31, %v1192_v58  ;;  %v1293_v14 = vsub.f32 1.0, %v1289_v26 }
 0x2ca   : > { %v1151_v27 = vadd.f32 %v1143_v24, %v1087_v7 }
 0x2cd   : > { %v1055_v44 = vpop.permute.xlu1 %1054 }
 0x2ce   : > { %v1072_v1 = vsel %vm925_vm11, %v1053_v22, %v1055_v44  ;;  %v1142_v22 = vmul.f32 %v2689_v61, %v1118_v51 }
 0x2cf   : > { %v1088_v18 = vadd.f32 %v1072_v1, %v1000_v63  ;;  %v1297_v63 = vmul.f32 %v1293_v14, %v1205_v25 }
 0x2d0   : > { %v1150_v15 = vadd.f32 %v1142_v22, %v1086_v52 }
 0x2d1   : > { %v1152_v5 = vadd.f32 %v1144_v48, %v1088_v18  ;;  %v1301_v38 = vadd.f32 1.0, %v1297_v63 }
 0x2d3   : > { %v1184_v17 = vadd.f32 %v2698_v19, %v1152_v5  ;;  %v1305_v40 = vmul.f32 %v1301_v38, %v1193_v29 }
 0x2d5   : > { %v1165_v39 = vpop.permute.xlu1 %1164  ;;  %v1308_v12 = vmul.f32 %v1304_v9, %v1184_v17 }
 0x2d6   : > { %v1182_v35 = vadd.f32 %v1165_v39, %v1150_v15  ;;  %v1183_v46 = vadd.f32 %v1165_v39, %v1151_v27 }
 0x2d8   : > { %v1306_v61 = vmul.f32 %v1302_v55, %v1182_v35  ;;  %v1307_v2 = vmul.f32 %v1303_v47, %v1183_v46 }
 0x2da   : > { %v1311_v37 = vpack.c.bf16 %v1308_v12, %v1306_v61 }
 0x2dc   : > { %1330 = vmatpush.bf16.msra.mxu3 %v1311_v37 }
 0x2dd   : > { %v800_v10 = vpop.permute.xlu1 %799 }
 0x2de   : > { %v816_v54 = vsel %vm668_vm10, %v2659_v62, %v800_v10  ;;  %v1145_v62 = vmul.f32 %v2759_v6, %v1121_v41 }
 0x2df   : > { %v832_v49 = vadd.f32 %v816_v54, %v2407_v32  ;;  %1468 = vmatmul.msk.bf16.vlgmr.msra.gmra.mxu3 %vm1319_vm15, %v1310_v53  ;;  %v1073_v32 = vsel %vm925_vm11, %v1055_v44, %v1057_v59 }
 0x2e1   : > { %v896_v57 = vadd.f32 %v888_v33, %v832_v49 }
 0x2e3   : > { %v1001_v20 = vadd.f32 %v993_v4, %v896_v57 }
 0x2e5   : > { %v1089_v42 = vadd.f32 %v1073_v32, %v1001_v20  ;;  %v1317_v6 = vpop.permute.xlu1 %1316 }
 0x2e7   : > { %v1153_v1 = vadd.f32 %v1145_v62, %v1089_v42 }
 0x2e9   : > { %v1185_v34 = vadd.f32 %v2698_v19, %v1153_v1 }
 0x2eb   : > { %v1309_v0 = vmul.f32 %v1305_v40, %v1185_v34 }
 0x2ed   : > { %v1312_v48 = vpack.c.bf16 %v1309_v0, %v1307_v2 }
 0x2ef   : > { %1343 = vmatpush.bf16.msrb.mxu3 %v1312_v48 }
 0x2f2   : > { %1469 = vmatmul.msk.bf16.vlgmr.msrb.gmra.mxu3 %vm1319_vm15, %v1310_v53 }
 0x362   : > { %v1332_v23 = vpop.f32.mrf.mxu3 }
 0x363   : > { %v1333_v19 = vadd.f32 %v1332_v23, %v1317_v6 }
 0x36a   : > { %v1334_v18 = vpop.f32.mrf.mxu3 }
 0x375   : > { %v1345_v44 = vpop.f32.mrf.mxu3 }
 0x376   : > { %v1346_v50 = vadd.f32 %v1345_v44, %v1317_v6 }
 0x378   : > { %v1351_v31 = vrot.slane %v1346_v50, 4 }
 0x37a   : > { %v1353_v52 = vsel %vm1352_vm1, %v1333_v19, %v1351_v31 }
 0x37b   : > { %1355 = vst [vmem:[%s285_s8] sm:$0xff] %v1353_v52 }
 0x37c   : > { %1626 = shalt.err (!%p1623_p5)
}
 0x37d   : > { %1479 = dma.vmem_to_hbm [thread:$0]  (%p1773_p4), %s1373_s10, 128, %s1375_s12, %s1357_s15   ;;  %v1347_v7 = vpop.f32.mrf.mxu3 }
 0x37e PF: > { %p1485_p6 = scmp.ge.s32.totalorder %s1677_s29, 2  ;;  %s1386_s19 = sand.u32 1, %s1657_s24  }
 0x37f   : > { %s1387_s23 = scalar_lea.sflag [#allocation3], %s1386_s19 }
 0x380   : > { %p1482_p7 = pnand %p1485_p6, %p1780_p8 }
 0x382   : > { %p1483_p9 = pneg %p1482_p7 }
 0x384   : > { %1652 = dma.done.wait (%p1483_p9), %s1387_s23, 128  }
 0x385   : > { %1654 = vsyncadd (%p1483_p9), %s1387_s23, 4294967168  ;;  %s20_s29 = sadd.s32 1, %s1677_s29   ;;  %s2909_s24 = smov %s1661_s25 }
 0x386   : > { %p17_p10 = scmp.ge.s32.totalorder %s20_s29, 4   ;;  %s2910_s25 = smov %s1665_s26 }
 0x387   : > { %s2911_s26 = smov %s1786_s14  ;;  %s2912_s27 = smov %s1673_s28 }
 0x388   : > { %s2913_s28 = smov %s2915_s9  ;;  %19 = sbr.rel (!%p17_p10) target bundleno = 4 (0x4), region = 84 }
 0x38d   :  { %1393 = vsyncpa [#allocation3], 1 }
 0x38e   :  { %1395 = vsyncpa [#allocation3 + $0x1], 1 }

</bundles_post_ra>
